<compile_context>
chip_gen: v5e
topology: v5e:2x2
jax: 0.10.0
libtpu: 0.0.40
codegen_flags: <defaults>
</compile_context>

<pallas_src>
import functools

import jax
import jax.numpy as jnp
from jax import lax
from jax.experimental import pallas as pl
from jax.experimental.pallas import tpu as pltpu


def _round_up(x, m):
    return (x + m - 1) // m * m


def bahdanau_block_kernel(len_ref, enc_ref, hd_ref,
                          w1e_ref, w2_ref, b2_ref, w3_ref,
                          ctx_ref, *, approx_recip=True):
    BB, T, E = enc_ref.shape
    Hp = w2_ref.shape[-1]
    cd = w1e_ref.dtype                                    # matmul compute dtype

    # --- MLP scorer.  concat([enc, tile(dec)]) @ W1 is split into
    # enc @ W1_enc (here, MXU, M = BB*T) + (dec @ W1_dec + b1), the latter
    # precomputed once for the whole batch and streamed in as hd_ref. ---------
    h = jnp.dot(enc_ref[...].reshape(BB * T, E).astype(cd), w1e_ref[...],
                preferred_element_type=jnp.float32)       # (BB*T, Hp) f32 acc
    h = h.reshape(BB, T, Hp) + hd_ref[...][:, None, :]    # b1 already folded in
    h = jnp.maximum(h, 0.0)                               # ReLU (f32)

    h = jnp.dot(h.reshape(BB * T, Hp).astype(cd), w2_ref[...],
                preferred_element_type=jnp.float32) + b2_ref[...]
    h = jnp.maximum(h, 0.0)                               # (BB*T, Hp) f32

    # --- final Linear(H, 1): VPU multiply + lane reduce (avoid an N=1 matmul),
    # producing lane-dense (BB, T) scores.  The scalar bias b3 is omitted:
    # softmax is invariant to a constant shift of the row. --------------------
    scores = jnp.sum(h.reshape(BB, T, Hp) * w3_ref[...], axis=-1)   # (BB, T)

    # --- length masking + softmax over the lane (timestep) axis. -------------
    t_idx = lax.broadcasted_iota(jnp.int32, (BB, T), 1)
    mask = t_idx >= len_ref[...]                          # (BB,1) -> (BB,T)
    scores = jnp.where(mask, -1e30, scores)               # finite fill: no NaN
    m = jnp.max(scores, axis=-1, keepdims=True)
    e = jnp.exp(scores - m)
    denom = jnp.sum(e, axis=-1, keepdims=True)
    probs = e * pl.reciprocal(denom, approx=approx_recip)
    probs = jnp.where(mask, 0.0, probs)                   # exact zeros (matches torch)

    # --- context[b, :] = sum_t probs[b, t] * enc[b, t, :].  Re-read enc from
    # the resident VMEM block (cheap vld) rather than keeping it live across
    # the matmuls and the softmax; multiply in the compute dtype (packed VPU
    # on v6e/v7x for bf16), accumulate in f32. --------------------------------
    enc2 = enc_ref[...].astype(cd)
    prod = enc2 * probs.astype(cd)[:, :, None]
    ctx = jnp.sum(prod.astype(jnp.float32), axis=1)
    ctx_ref[...] = ctx.astype(ctx_ref.dtype)              # (BB, E)


def _device_kind():
    try:
        return jax.devices()[0].device_kind.lower()
    except Exception:
        return ""


def bahdanau_attention(encoder_out, decoder_hidden, encoder_length, params,
                       *, block_b=None, compute_dtype=jnp.float32,
                       approx_recip=True, vmem_limit_bytes=None,
                       core_parallel=None):
    B, T, E = encoder_out.shape
    H = params["w1"].shape[0]
    Hp = _round_up(H, 128)

    cd = jnp.dtype(compute_dtype)
    f32 = jnp.float32

    kind = _device_kind()
    is_v7x = "7" in kind
    is_v5e = "v5e" in kind or "v5 lite" in kind or "v5lite" in kind

    # --- per-generation VMEM budget (also requested as vmem_limit_bytes). ----
    if vmem_limit_bytes is None:
        # v7x: 64 MiB physical VMEM per core; v5e/v6e: 128 MiB physical.
        vmem_limit_bytes = (48 << 20) if is_v7x else (96 << 20)
    vmem_budget = (vmem_limit_bytes * 3) // 4              # headroom

    # --- small, resident weights: torch Linear stores (out, in); transpose to
    # (in, out) and zero-pad H -> Hp once (cheap; these stay in VMEM). --------
    w1 = params["w1"]
    w1e = jnp.zeros((E, Hp), cd).at[:, :H].set(w1[:, :E].T.astype(cd))
    w2 = jnp.zeros((Hp, Hp), cd).at[:H, :H].set(params["w2"].T.astype(cd))
    b2 = jnp.zeros((1, Hp), f32).at[0, :H].set(params["b2"].astype(f32))
    w3 = jnp.zeros((1, Hp), f32).at[0, :H].set(params["w3"].reshape(-1).astype(f32))
    weight_bytes = (w1e.size + w2.size) * cd.itemsize + (b2.size + w3.size) * 4

    # --- hoisted decoder half of the first Linear: one full-batch matmul
    # (M = B) instead of an underfilled M = BB matmul per grid step; b1 is
    # folded here, before the broadcast over T.  Result is tiny: (B, Hp) f32. -
    hd = jnp.dot(decoder_hidden.astype(cd), w1[:, E:].T.astype(cd),
                 preferred_element_type=f32,
                 precision=lax.Precision.HIGHEST) + params["b1"].astype(f32)
    hd = jnp.pad(hd, ((0, 0), (0, Hp - H)))

    lengths = encoder_length.astype(jnp.int32).reshape(B, 1)

    # --- batch-block size BB (multiple of 8): fill the MXU M dim, amortize the
    # per-step pipeline overhead with ~>=1 MiB enc DMA blocks, stay inside the
    # VMEM budget.  No zero-padding of the batch: grid = cdiv(B, BB) and Mosaic
    # clips the edge block's DMAs (out-of-bounds writes are dropped). ---------
    if block_b is None:
        mxu_m = 128 if is_v5e else 256                     # v5e MXU is 4x128^2
        enc_row_bytes = T * E * encoder_out.dtype.itemsize
        bb = _round_up(pl.cdiv(mxu_m, T), 8)                       # MXU M fill
        bb = max(bb, _round_up(pl.cdiv(1 << 20, max(enc_row_bytes, 1)), 8))
        # VMEM per batch row: double-buffered enc + hd, f32 intermediates, ctx.
        row_vmem = (2 * enc_row_bytes + 2 * Hp * 4 + 3 * T * Hp * 4
                    + T * E * 4 + 2 * E * 4)
        bb_cap = max(8, (max(vmem_budget - weight_bytes, row_vmem)
                         // row_vmem) // 8 * 8)
        block_b = max(8, min(bb, bb_cap, _round_up(B, 8)))
    BB = block_b
    grid_b = pl.cdiv(B, BB)

    if core_parallel is None:
        # Only CORE_PARALLEL actually splits the grid over v7x's 2 TensorCores;
        # plain "parallel" is kept on single-TC chips and for size-1 grids.
        core_parallel = is_v7x and grid_b >= 2
    dim_sem = (pltpu.CORE_PARALLEL,) if core_parallel else ("parallel",)

    kernel = functools.partial(bahdanau_block_kernel, approx_recip=approx_recip)
    out_dtype = encoder_out.dtype

    def run(weight_mode, compiler_params):
        def const_spec(shape):
            kwargs = {} if weight_mode is None else {"pipeline_mode": weight_mode}
            return pl.BlockSpec(shape, lambda i: (0, 0), **kwargs)

        return pl.pallas_call(
            kernel,
            out_shape=jax.ShapeDtypeStruct((B, E), out_dtype),
            grid=(grid_b,),
            in_specs=[
                pl.BlockSpec((BB, 1), lambda i: (i, 0)),        # lengths
                pl.BlockSpec((BB, T, E), lambda i: (i, 0, 0)),  # encoder_out (unpadded)
                pl.BlockSpec((BB, Hp), lambda i: (i, 0)),       # hd = dec@W1d + b1
                const_spec((E, Hp)),                            # W1 (encoder part)
                const_spec((Hp, Hp)),                           # W2
                const_spec((1, Hp)),                            # b2
                const_spec((1, Hp)),                            # W3 (as a row)
            ],
            out_specs=pl.BlockSpec((BB, E), lambda i: (i, 0)),
            compiler_params=compiler_params,
        )(lengths, encoder_out, hd, w1e, w2, b2, w3)

    try:
        # Preferred path: single-buffered resident weights + explicit VMEM limit.
        return run(pl.Buffered(1),
                   pltpu.CompilerParams(dimension_semantics=dim_sem,
                                        vmem_limit_bytes=vmem_limit_bytes))
    except Exception:
        # Conservative fallback (older jax / unsupported options): default
        # buffering, plain "parallel" semantics, default scoped-VMEM limit.
        return run(None,
                   pltpu.CompilerParams(dimension_semantics=("parallel",)))


def reference(encoder_out, decoder_hidden, encoder_length, params):
    """Plain-JAX transcription of the PyTorch forward (for verification)."""
    B, T, E = encoder_out.shape
    dec_t = jnp.broadcast_to(decoder_hidden[:, None, :],
                             (B, T, decoder_hidden.shape[-1]))
    x = jnp.concatenate([encoder_out, dec_t], axis=-1)
    h = jax.nn.relu(x @ params["w1"].T + params["b1"])
    h = jax.nn.relu(h @ params["w2"].T + params["b2"])
    scores = (h @ params["w3"].T + params["b3"]).reshape(B, T)
    mask = jnp.arange(T)[None, :] >= encoder_length[:, None]
    scores = jnp.where(mask, -jnp.inf, scores)
    probs = jax.nn.softmax(scores, axis=-1)
    probs = jnp.where(mask, 0.0, probs)
    return jnp.einsum("bte,bt->be", encoder_out, probs)


if __name__ == "__main__":
    B, T = 2, 8                 # batch, timesteps
    E, D, H = 32, 32, 32        # encoder_size, decoder_size, hidden_size

    key = jax.random.PRNGKey(0)
    k_enc, k_dec, k1, k2, k3, k4, k5, k6 = jax.random.split(key, 8)

    encoder_out = jax.random.normal(k_enc, (B, T, E), jnp.float32)
    decoder_hidden = jax.random.normal(k_dec, (B, D), jnp.float32)
    encoder_length = jnp.array([5, 8], dtype=jnp.int32)

    # Deterministic synthetic parameters (PyTorch Linear layout: (out, in)).
    params = {
        "w1": 0.1 * jax.random.normal(k1, (H, E + D), jnp.float32),
        "b1": 0.1 * jax.random.normal(k2, (H,), jnp.float32),
        "w2": 0.1 * jax.random.normal(k3, (H, H), jnp.float32),
        "b2": 0.1 * jax.random.normal(k4, (H,), jnp.float32),
        "w3": 0.1 * jax.random.normal(k5, (1, H), jnp.float32),
        "b3": 0.1 * jax.random.normal(k6, (1,), jnp.float32),
    }

    ref = reference(encoder_out, decoder_hidden, encoder_length, params)

    # (1) exact-reciprocal f32 mode: tight semantics check vs. the PyTorch math.
    ctx = bahdanau_attention(encoder_out, decoder_hidden, encoder_length,
                             params, approx_recip=False)
    ctx = jax.block_until_ready(ctx)
    assert ctx.shape == (B, E)
    assert jnp.allclose(ctx, ref, atol=1e-5, rtol=1e-5), (ctx, ref)

    # (2) default fast mode: EUP approximate reciprocal in the softmax.
    ctx_fast = jax.block_until_ready(
        bahdanau_attention(encoder_out, decoder_hidden, encoder_length, params))
    assert jnp.allclose(ctx_fast, ref, atol=5e-3, rtol=5e-3), (ctx_fast, ref)

    # (3) bf16 matmul / context-multiply inputs (v6e/v7x roofline lever), with
    #     f32 accumulation and f32 softmax.
    ctx_bf16 = jax.block_until_ready(
        bahdanau_attention(encoder_out, decoder_hidden, encoder_length, params,
                           compute_dtype=jnp.bfloat16))
    assert jnp.allclose(ctx_bf16, ref, atol=5e-2, rtol=5e-2), (ctx_bf16, ref)

    # (4) multi-step grid with a clipped (partial) edge block: B=12, block_b=8.
    B2 = 12
    kb1, kb2, kb3 = jax.random.split(jax.random.PRNGKey(1), 3)
    enc2 = jax.random.normal(kb1, (B2, T, E), jnp.float32)
    dec2 = jax.random.normal(kb2, (B2, D), jnp.float32)
    len2 = jax.random.randint(kb3, (B2,), 1, T + 1, dtype=jnp.int32)
    ref2 = reference(enc2, dec2, len2, params)
    ctx2 = jax.block_until_ready(
        bahdanau_attention(enc2, dec2, len2, params, block_b=8))
    assert ctx2.shape == (B2, E)
    assert jnp.allclose(ctx2, ref2, atol=5e-3, rtol=5e-3), (ctx2, ref2)

    print("KERNEL_OK")
</pallas_src>

<mosaic_0001>
module attributes {stable_mosaic.version = 11 : i64} {
  func.func @bahdanau_block_kernel(%arg0: i32, %arg1: memref<8x1xi32, #tpu.memory_space<vmem>>, %arg2: memref<8x8x32xf32, #tpu.memory_space<vmem>>, %arg3: memref<8x128xf32, #tpu.memory_space<vmem>>, %arg4: memref<32x128xf32, #tpu.memory_space<vmem>>, %arg5: memref<128x128xf32, #tpu.memory_space<vmem>>, %arg6: memref<1x128xf32, #tpu.memory_space<vmem>>, %arg7: memref<1x128xf32, #tpu.memory_space<vmem>>, %arg8: memref<8x32xf32, #tpu.memory_space<vmem>>) attributes {dimension_semantics = [#tpu.dimension_semantics<parallel>], iteration_bounds = array<i64: 1>, scalar_prefetch = 0 : i64, scratch_operands = 0 : i64, tpu.core_type = #tpu.core_type<tc>, window_params = [{transform_indices = @transform_0, window_bounds = array<i64: 8, 1>}, {transform_indices = @transform_1, window_bounds = array<i64: 8, 8, 32>}, {transform_indices = @transform_2, window_bounds = array<i64: 8, 128>}, {pipeline_mode = #tpu.pipeline_mode<synchronous>, transform_indices = @transform_3, window_bounds = array<i64: 32, 128>}, {pipeline_mode = #tpu.pipeline_mode<synchronous>, transform_indices = @transform_4, window_bounds = array<i64: 128, 128>}, {pipeline_mode = #tpu.pipeline_mode<synchronous>, transform_indices = @transform_5, window_bounds = array<i64: 1, 128>}, {pipeline_mode = #tpu.pipeline_mode<synchronous>, transform_indices = @transform_6, window_bounds = array<i64: 1, 128>}, {transform_indices = @transform_7, window_bounds = array<i64: 8, 32>}]} {
    %c0 = arith.constant 0 : index
    %c0_0 = arith.constant 0 : index
    %c0_1 = arith.constant 0 : index
    %0 = vector.load %arg2[%c0, %c0_0, %c0_1] : memref<8x8x32xf32, #tpu.memory_space<vmem>>, vector<8x8x32xf32>
    %1 = vector.shape_cast %0 : vector<8x8x32xf32> to vector<64x32xf32>
    %c0_2 = arith.constant 0 : index
    %c0_3 = arith.constant 0 : index
    %2 = vector.load %arg4[%c0_2, %c0_3] : memref<32x128xf32, #tpu.memory_space<vmem>>, vector<32x128xf32>
    %cst = arith.constant dense<0.000000e+00> : vector<64x128xf32>
    %3 = tpu.matmul %1, %2, %cst {dimension_numbers = #tpu.dot_dimension_numbers<[1], [0], [0], [1], [0, 0, 1, 1], [], []>} : vector<64x32xf32>, vector<32x128xf32>, vector<64x128xf32> -> vector<64x128xf32>
    %4 = vector.shape_cast %3 : vector<64x128xf32> to vector<8x8x128xf32>
    %c0_4 = arith.constant 0 : index
    %c0_5 = arith.constant 0 : index
    %5 = vector.load %arg3[%c0_4, %c0_5] : memref<8x128xf32, #tpu.memory_space<vmem>>, vector<8x128xf32>
    %6 = vector.shape_cast %5 : vector<8x128xf32> to vector<8x1x128xf32>
    %7 = vector.broadcast %6 : vector<8x1x128xf32> to vector<8x8x128xf32>
    %8 = arith.addf %4, %7 : vector<8x8x128xf32>
    %cst_6 = arith.constant 0.000000e+00 : f32
    %9 = vector.broadcast %cst_6 : f32 to vector<8x8x128xf32>
    %10 = arith.maximumf %8, %9 : vector<8x8x128xf32>
    %11 = vector.shape_cast %10 : vector<8x8x128xf32> to vector<64x128xf32>
    %c0_7 = arith.constant 0 : index
    %c0_8 = arith.constant 0 : index
    %12 = vector.load %arg5[%c0_7, %c0_8] : memref<128x128xf32, #tpu.memory_space<vmem>>, vector<128x128xf32>
    %cst_9 = arith.constant dense<0.000000e+00> : vector<64x128xf32>
    %13 = tpu.matmul %11, %12, %cst_9 {dimension_numbers = #tpu.dot_dimension_numbers<[1], [0], [0], [1], [0, 0, 1, 1], [], []>} : vector<64x128xf32>, vector<128x128xf32>, vector<64x128xf32> -> vector<64x128xf32>
    %c0_10 = arith.constant 0 : index
    %c0_11 = arith.constant 0 : index
    %14 = vector.load %arg6[%c0_10, %c0_11] : memref<1x128xf32, #tpu.memory_space<vmem>>, vector<1x128xf32>
    %15 = vector.broadcast %14 : vector<1x128xf32> to vector<64x128xf32>
    %16 = arith.addf %13, %15 : vector<64x128xf32>
    %cst_12 = arith.constant 0.000000e+00 : f32
    %17 = vector.broadcast %cst_12 : f32 to vector<64x128xf32>
    %18 = arith.maximumf %16, %17 : vector<64x128xf32>
    %19 = vector.shape_cast %18 : vector<64x128xf32> to vector<8x8x128xf32>
    %c0_13 = arith.constant 0 : index
    %c0_14 = arith.constant 0 : index
    %20 = vector.load %arg7[%c0_13, %c0_14] : memref<1x128xf32, #tpu.memory_space<vmem>>, vector<1x128xf32>
    %21 = vector.shape_cast %20 : vector<1x128xf32> to vector<1x1x128xf32>
    %22 = vector.broadcast %21 : vector<1x1x128xf32> to vector<8x8x128xf32>
    %23 = arith.mulf %19, %22 : vector<8x8x128xf32>
    %cst_15 = arith.constant dense<0.000000e+00> : vector<8x8xf32>
    %24 = vector.multi_reduction <add>, %23, %cst_15 [2] : vector<8x8x128xf32> to vector<8x8xf32>
    %25 = tpu.iota {dimensions = array<i32: 1>} : vector<8x8xi32>
    %c0_16 = arith.constant 0 : index
    %c0_17 = arith.constant 0 : index
    %26 = vector.load %arg1[%c0_16, %c0_17] : memref<8x1xi32, #tpu.memory_space<vmem>>, vector<8x1xi32>
    %27 = vector.broadcast %26 : vector<8x1xi32> to vector<8x8xi32>
    %28 = arith.cmpi sge, %25, %27 : vector<8x8xi32>
    %cst_18 = arith.constant -1.000000e+30 : f32
    %29 = vector.broadcast %cst_18 : f32 to vector<8x8xf32>
    %30 = arith.select %28, %29, %24 : vector<8x8xi1>, vector<8x8xf32>
    %cst_19 = arith.constant dense<0xFF800000> : vector<8xf32>
    %31 = vector.multi_reduction <maximumf>, %30, %cst_19 [1] : vector<8x8xf32> to vector<8xf32>
    %32 = vector.shape_cast %31 : vector<8xf32> to vector<8x1xf32>
    %33 = vector.broadcast %32 : vector<8x1xf32> to vector<8x8xf32>
    %34 = arith.subf %30, %33 : vector<8x8xf32>
    %35 = math.exp %34 : vector<8x8xf32>
    %cst_20 = arith.constant dense<0.000000e+00> : vector<8xf32>
    %36 = vector.multi_reduction <add>, %35, %cst_20 [1] : vector<8x8xf32> to vector<8xf32>
    %37 = vector.shape_cast %36 : vector<8xf32> to vector<8x1xf32>
    %38 = tpu.reciprocal %37 : vector<8x1xf32> -> vector<8x1xf32>
    %39 = vector.broadcast %38 : vector<8x1xf32> to vector<8x8xf32>
    %40 = arith.mulf %35, %39 : vector<8x8xf32>
    %cst_21 = arith.constant 0.000000e+00 : f32
    %41 = vector.broadcast %cst_21 : f32 to vector<8x8xf32>
    %42 = arith.select %28, %41, %40 : vector<8x8xi1>, vector<8x8xf32>
    %c0_22 = arith.constant 0 : index
    %c0_23 = arith.constant 0 : index
    %c0_24 = arith.constant 0 : index
    %43 = vector.load %arg2[%c0_22, %c0_23, %c0_24] : memref<8x8x32xf32, #tpu.memory_space<vmem>>, vector<8x8x32xf32>
    %44 = vector.shape_cast %42 : vector<8x8xf32> to vector<8x8x1xf32>
    %45 = vector.broadcast %44 : vector<8x8x1xf32> to vector<8x8x32xf32>
    %46 = arith.mulf %43, %45 : vector<8x8x32xf32>
    %cst_25 = arith.constant dense<0.000000e+00> : vector<8x32xf32>
    %47 = vector.multi_reduction <add>, %46, %cst_25 [1] : vector<8x8x32xf32> to vector<8x32xf32>
    %c0_26 = arith.constant 0 : index
    %c0_27 = arith.constant 0 : index
    %48 = vector.load %arg8[%c0_26, %c0_27] : memref<8x32xf32, #tpu.memory_space<vmem>>, vector<8x32xf32>
    tpu.vector_store %arg8[%c0_26, %c0_27], %47 {strides = array<i32>} : memref<8x32xf32, #tpu.memory_space<vmem>>, vector<8x32xf32>,
    return
  }
  func.func @transform_0(%arg0: i32) -> (i32, i32) {
    %c0_i32 = arith.constant 0 : i32
    %c0_i32_0 = arith.constant 0 : i32
    return %arg0, %c0_i32 : i32, i32
  }
  func.func @transform_1(%arg0: i32) -> (i32, i32, i32) {
    %c0_i32 = arith.constant 0 : i32
    %c0_i32_0 = arith.constant 0 : i32
    %c0_i32_1 = arith.constant 0 : i32
    return %arg0, %c0_i32, %c0_i32_0 : i32, i32, i32
  }
  func.func @transform_2(%arg0: i32) -> (i32, i32) {
    %c0_i32 = arith.constant 0 : i32
    %c0_i32_0 = arith.constant 0 : i32
    return %arg0, %c0_i32 : i32, i32
  }
  func.func @transform_3(%arg0: i32) -> (i32, i32) {
    %c0_i32 = arith.constant 0 : i32
    %c0_i32_0 = arith.constant 0 : i32
    %c0_i32_1 = arith.constant 0 : i32
    return %c0_i32, %c0_i32_0 : i32, i32
  }
  func.func @transform_4(%arg0: i32) -> (i32, i32) {
    %c0_i32 = arith.constant 0 : i32
    %c0_i32_0 = arith.constant 0 : i32
    %c0_i32_1 = arith.constant 0 : i32
    return %c0_i32, %c0_i32_0 : i32, i32
  }
  func.func @transform_5(%arg0: i32) -> (i32, i32) {
    %c0_i32 = arith.constant 0 : i32
    %c0_i32_0 = arith.constant 0 : i32
    %c0_i32_1 = arith.constant 0 : i32
    return %c0_i32, %c0_i32_0 : i32, i32
  }
  func.func @transform_6(%arg0: i32) -> (i32, i32) {
    %c0_i32 = arith.constant 0 : i32
    %c0_i32_0 = arith.constant 0 : i32
    %c0_i32_1 = arith.constant 0 : i32
    return %c0_i32, %c0_i32_0 : i32, i32
  }
  func.func @transform_7(%arg0: i32) -> (i32, i32) {
    %c0_i32 = arith.constant 0 : i32
    %c0_i32_0 = arith.constant 0 : i32
    return %arg0, %c0_i32 : i32, i32
  }
}

module attributes {stable_mosaic.version = 11 : i64} {
  func.func @bahdanau_block_kernel(%arg0: i32, %arg1: memref<8x1xi32, #tpu.memory_space<vmem>>, %arg2: memref<8x8x32xf32, #tpu.memory_space<vmem>>, %arg3: memref<8x128xf32, #tpu.memory_space<vmem>>, %arg4: memref<32x128xf32, #tpu.memory_space<vmem>>, %arg5: memref<128x128xf32, #tpu.memory_space<vmem>>, %arg6: memref<1x128xf32, #tpu.memory_space<vmem>>, %arg7: memref<1x128xf32, #tpu.memory_space<vmem>>, %arg8: memref<8x32xf32, #tpu.memory_space<vmem>>) attributes {dimension_semantics = [#tpu.dimension_semantics<parallel>], iteration_bounds = array<i64: 1>, scalar_prefetch = 0 : i64, scratch_operands = 0 : i64, tpu.core_type = #tpu.core_type<tc>, window_params = [{transform_indices = @transform_0, window_bounds = array<i64: 8, 1>}, {transform_indices = @transform_1, window_bounds = array<i64: 8, 8, 32>}, {transform_indices = @transform_2, window_bounds = array<i64: 8, 128>}, {pipeline_mode = #tpu.pipeline_mode<synchronous>, transform_indices = @transform_3, window_bounds = array<i64: 32, 128>}, {pipeline_mode = #tpu.pipeline_mode<synchronous>, transform_indices = @transform_4, window_bounds = array<i64: 128, 128>}, {pipeline_mode = #tpu.pipeline_mode<synchronous>, transform_indices = @transform_5, window_bounds = array<i64: 1, 128>}, {pipeline_mode = #tpu.pipeline_mode<synchronous>, transform_indices = @transform_6, window_bounds = array<i64: 1, 128>}, {transform_indices = @transform_7, window_bounds = array<i64: 8, 32>}]} {
    %c0 = arith.constant 0 : index
    %c0_0 = arith.constant 0 : index
    %c0_1 = arith.constant 0 : index
    %0 = vector.load %arg2[%c0, %c0_0, %c0_1] : memref<8x8x32xf32, #tpu.memory_space<vmem>>, vector<8x8x32xf32>
    %1 = vector.shape_cast %0 : vector<8x8x32xf32> to vector<64x32xf32>
    %c0_2 = arith.constant 0 : index
    %c0_3 = arith.constant 0 : index
    %2 = vector.load %arg4[%c0_2, %c0_3] : memref<32x128xf32, #tpu.memory_space<vmem>>, vector<32x128xf32>
    %cst = arith.constant dense<0.000000e+00> : vector<64x128xf32>
    %3 = tpu.matmul %1, %2, %cst {dimension_numbers = #tpu.dot_dimension_numbers<[1], [0], [0], [1], [0, 0, 1, 1], [], []>} : vector<64x32xf32>, vector<32x128xf32>, vector<64x128xf32> -> vector<64x128xf32>
    %4 = vector.shape_cast %3 : vector<64x128xf32> to vector<8x8x128xf32>
    %c0_4 = arith.constant 0 : index
    %c0_5 = arith.constant 0 : index
    %5 = vector.load %arg3[%c0_4, %c0_5] : memref<8x128xf32, #tpu.memory_space<vmem>>, vector<8x128xf32>
    %6 = vector.shape_cast %5 : vector<8x128xf32> to vector<8x1x128xf32>
    %7 = vector.broadcast %6 : vector<8x1x128xf32> to vector<8x8x128xf32>
    %8 = arith.addf %4, %7 : vector<8x8x128xf32>
    %cst_6 = arith.constant 0.000000e+00 : f32
    %9 = vector.broadcast %cst_6 : f32 to vector<8x8x128xf32>
    %10 = arith.maximumf %8, %9 : vector<8x8x128xf32>
    %11 = vector.shape_cast %10 : vector<8x8x128xf32> to vector<64x128xf32>
    %c0_7 = arith.constant 0 : index
    %c0_8 = arith.constant 0 : index
    %12 = vector.load %arg5[%c0_7, %c0_8] : memref<128x128xf32, #tpu.memory_space<vmem>>, vector<128x128xf32>
    %cst_9 = arith.constant dense<0.000000e+00> : vector<64x128xf32>
    %13 = tpu.matmul %11, %12, %cst_9 {dimension_numbers = #tpu.dot_dimension_numbers<[1], [0], [0], [1], [0, 0, 1, 1], [], []>} : vector<64x128xf32>, vector<128x128xf32>, vector<64x128xf32> -> vector<64x128xf32>
    %c0_10 = arith.constant 0 : index
    %c0_11 = arith.constant 0 : index
    %14 = vector.load %arg6[%c0_10, %c0_11] : memref<1x128xf32, #tpu.memory_space<vmem>>, vector<1x128xf32>
    %15 = vector.broadcast %14 : vector<1x128xf32> to vector<64x128xf32>
    %16 = arith.addf %13, %15 : vector<64x128xf32>
    %cst_12 = arith.constant 0.000000e+00 : f32
    %17 = vector.broadcast %cst_12 : f32 to vector<64x128xf32>
    %18 = arith.maximumf %16, %17 : vector<64x128xf32>
    %19 = vector.shape_cast %18 : vector<64x128xf32> to vector<8x8x128xf32>
    %c0_13 = arith.constant 0 : index
    %c0_14 = arith.constant 0 : index
    %20 = vector.load %arg7[%c0_13, %c0_14] : memref<1x128xf32, #tpu.memory_space<vmem>>, vector<1x128xf32>
    %21 = vector.shape_cast %20 : vector<1x128xf32> to vector<1x1x128xf32>
    %22 = vector.broadcast %21 : vector<1x1x128xf32> to vector<8x8x128xf32>
    %23 = arith.mulf %19, %22 : vector<8x8x128xf32>
    %cst_15 = arith.constant dense<0.000000e+00> : vector<8x8xf32>
    %24 = vector.multi_reduction <add>, %23, %cst_15 [2] : vector<8x8x128xf32> to vector<8x8xf32>
    %25 = tpu.iota {dimensions = array<i32: 1>} : vector<8x8xi32>
    %c0_16 = arith.constant 0 : index
    %c0_17 = arith.constant 0 : index
    %26 = vector.load %arg1[%c0_16, %c0_17] : memref<8x1xi32, #tpu.memory_space<vmem>>, vector<8x1xi32>
    %27 = vector.broadcast %26 : vector<8x1xi32> to vector<8x8xi32>
    %28 = arith.cmpi sge, %25, %27 : vector<8x8xi32>
    %cst_18 = arith.constant -1.000000e+30 : f32
    %29 = vector.broadcast %cst_18 : f32 to vector<8x8xf32>
    %30 = arith.select %28, %29, %24 : vector<8x8xi1>, vector<8x8xf32>
    %cst_19 = arith.constant dense<0xFF800000> : vector<8xf32>
    %31 = vector.multi_reduction <maximumf>, %30, %cst_19 [1] : vector<8x8xf32> to vector<8xf32>
    %32 = vector.shape_cast %31 : vector<8xf32> to vector<8x1xf32>
    %33 = vector.broadcast %32 : vector<8x1xf32> to vector<8x8xf32>
    %34 = arith.subf %30, %33 : vector<8x8xf32>
    %35 = math.exp %34 : vector<8x8xf32>
    %cst_20 = arith.constant dense<0.000000e+00> : vector<8xf32>
    %36 = vector.multi_reduction <add>, %35, %cst_20 [1] : vector<8x8xf32> to vector<8xf32>
    %37 = vector.shape_cast %36 : vector<8xf32> to vector<8x1xf32>
    %38 = tpu.reciprocal %37 : vector<8x1xf32> -> vector<8x1xf32>
    %39 = vector.broadcast %38 : vector<8x1xf32> to vector<8x8xf32>
    %40 = arith.mulf %35, %39 : vector<8x8xf32>
    %cst_21 = arith.constant 0.000000e+00 : f32
    %41 = vector.broadcast %cst_21 : f32 to vector<8x8xf32>
    %42 = arith.select %28, %41, %40 : vector<8x8xi1>, vector<8x8xf32>
    %c0_22 = arith.constant 0 : index
    %c0_23 = arith.constant 0 : index
    %c0_24 = arith.constant 0 : index
    %43 = vector.load %arg2[%c0_22, %c0_23, %c0_24] : memref<8x8x32xf32, #tpu.memory_space<vmem>>, vector<8x8x32xf32>
    %44 = vector.shape_cast %42 : vector<8x8xf32> to vector<8x8x1xf32>
    %45 = vector.broadcast %44 : vector<8x8x1xf32> to vector<8x8x32xf32>
    %46 = arith.mulf %43, %45 : vector<8x8x32xf32>
    %cst_25 = arith.constant dense<0.000000e+00> : vector<8x32xf32>
    %47 = vector.multi_reduction <add>, %46, %cst_25 [1] : vector<8x8x32xf32> to vector<8x32xf32>
    %c0_26 = arith.constant 0 : index
    %c0_27 = arith.constant 0 : index
    %48 = vector.load %arg8[%c0_26, %c0_27] : memref<8x32xf32, #tpu.memory_space<vmem>>, vector<8x32xf32>
    tpu.vector_store %arg8[%c0_26, %c0_27], %47 {strides = array<i32>} : memref<8x32xf32, #tpu.memory_space<vmem>>, vector<8x32xf32>,
    return
  }
  func.func @transform_0(%arg0: i32) -> (i32, i32) {
    %c0_i32 = arith.constant 0 : i32
    %c0_i32_0 = arith.constant 0 : i32
    return %arg0, %c0_i32 : i32, i32
  }
  func.func @transform_1(%arg0: i32) -> (i32, i32, i32) {
    %c0_i32 = arith.constant 0 : i32
    %c0_i32_0 = arith.constant 0 : i32
    %c0_i32_1 = arith.constant 0 : i32
    return %arg0, %c0_i32, %c0_i32_0 : i32, i32, i32
  }
  func.func @transform_2(%arg0: i32) -> (i32, i32) {
    %c0_i32 = arith.constant 0 : i32
    %c0_i32_0 = arith.constant 0 : i32
    return %arg0, %c0_i32 : i32, i32
  }
  func.func @transform_3(%arg0: i32) -> (i32, i32) {
    %c0_i32 = arith.constant 0 : i32
    %c0_i32_0 = arith.constant 0 : i32
    %c0_i32_1 = arith.constant 0 : i32
    return %c0_i32, %c0_i32_0 : i32, i32
  }
  func.func @transform_4(%arg0: i32) -> (i32, i32) {
    %c0_i32 = arith.constant 0 : i32
    %c0_i32_0 = arith.constant 0 : i32
    %c0_i32_1 = arith.constant 0 : i32
    return %c0_i32, %c0_i32_0 : i32, i32
  }
  func.func @transform_5(%arg0: i32) -> (i32, i32) {
    %c0_i32 = arith.constant 0 : i32
    %c0_i32_0 = arith.constant 0 : i32
    %c0_i32_1 = arith.constant 0 : i32
    return %c0_i32, %c0_i32_0 : i32, i32
  }
  func.func @transform_6(%arg0: i32) -> (i32, i32) {
    %c0_i32 = arith.constant 0 : i32
    %c0_i32_0 = arith.constant 0 : i32
    %c0_i32_1 = arith.constant 0 : i32
    return %c0_i32, %c0_i32_0 : i32, i32
  }
  func.func @transform_7(%arg0: i32) -> (i32, i32) {
    %c0_i32 = arith.constant 0 : i32
    %c0_i32_0 = arith.constant 0 : i32
    return %arg0, %c0_i32 : i32, i32
  }
}

</mosaic_0001>

<bundles_post_ra>
// kernel: tpu_custom_call.1
= control target key start
LH: loop header
LB: loop body
LE: loop exit
PB: predicated region body
PF: predicated region fallthrough
CT: control target
= control target key end

     0   :  { %12 = vsyncpa [#allocation3], 0  ;;  %s815_s0 = inlined_call_operand.vmem [shape: s32[2,1], index: 0, kind: input, shape index: {}]   ;;  %s816_s1 = inlined_call_operand.hbm [shape: f32[2,8,32], index: 1, kind: input, shape index: {}]   ;;  %s817_s2 = inlined_call_operand.vmem [shape: f32[2,128], index: 2, kind: input, shape index: {}]   ;;  %s818_s3 = inlined_call_operand.hbm [shape: f32[32,128], index: 3, kind: input, shape index: {}]   ;;  %s819_s4 = inlined_call_operand.hbm [shape: f32[128,128], index: 4, kind: input, shape index: {}]   ;;  %s820_s5 = inlined_call_operand.vmem [shape: f32[1,128], index: 5, kind: input, shape index: {}]   ;;  %s821_s6 = inlined_call_operand.vmem [shape: f32[1,128], index: 6, kind: input, shape index: {}]   ;;  %s822_s7 = inlined_call_operand.hbm [shape: f32[2,32], index: 7, kind: output, shape index: {}]  }
   0x1   :  { %13 = vsyncpa [#allocation6], 0 }
   0x2   :  { %14 = vsyncpa [#allocation4], 0 }
   0x3   :  { %20 = vsyncadd [#allocation3], 768  ;;  %s36_s26 = sshll.u32 %s818_s3, 4  ;;  %s677_s27 = smov [#allocation5]   ;;  %s37_s26 = int_to_ptr.hbm [resolvable:$true] %s36_s26 }
   0x4   :  { %s38_s28 = sshll.u32 %s677_s27, 4  ;;  %s21_s8 = sshll.u32 %s816_s1, 4  ;;  %s39_s28 = int_to_ptr.vmem [resolvable:$true] %s38_s28  ;;  %s22_s8 = int_to_ptr.hbm [resolvable:$true] %s21_s8 }
   0x5   :  { %s678_s9 = smov 128   ;;  %s679_s10 = smov 8  }
   0x6   :  { %44 = dma.hbm_to_vmem [thread:$0]  %s37_s26, 512, %s39_s28, [#allocation6], %s678_s9, %s678_s9, %s679_s10  }
   0x7   :  { %s680_s11 = smov [#allocation2]   ;;  %s49_s15 = sshll.u32 %s819_s4, 4  ;;  %s50_s15 = int_to_ptr.hbm [resolvable:$true] %s49_s15 }
   0x8   :  { %s23_s12 = sshll.u32 %s680_s11, 4  ;;  %s681_s3 = smov [#allocation7]   ;;  %s24_s12 = int_to_ptr.vmem [resolvable:$true] %s23_s12 }
   0x9   :  { %29 = dma.hbm_to_vmem [thread:$0]  %s22_s8, 256, %s24_s12, [#allocation3], %s678_s9, %s678_s9, %s679_s10  }
   0xa   :  { %s51_s16 = sshll.u32 %s681_s3, 4  ;;  %s52_s16 = int_to_ptr.vmem [resolvable:$true] %s51_s16 }
   0xb   :  { %57 = dma.hbm_to_vmem [thread:$0]  %s50_s15, 2048, %s52_s16, [#allocation6], %s678_s9, %s678_s9, %s679_s10  }
   0xc   :  { %671 = dma.done.wait [#allocation3], 1024  }
   0xd   :  { %672 = vsyncadd [#allocation3], 4294966272 }
   0xe   :  { %673 = dma.done.wait [#allocation6], 2560  }
   0xf   :  { %674 = vsyncadd [#allocation6], 4294964736  ;;  %v85_v0 = vld [vmem:[#allocation5 + $0x18] sm:$0xff]  ;;  %v84_v1 = vld [vmem:[#allocation5 + $0x10] sm:$0xff]  ;;  %vm86_vm0 = vcmask 261120   ;;  %vm313_vm1 = vcmask 1041409  }
  0x10   :  { %123 = vmatpush.msra.mxu0 %v85_v0  ;;  %520 = vmatpush.msra.mxu3 %v85_v0  ;;  %v83_v2 = vld [vmem:[#allocation5 + $0x8] sm:$0xff]  ;;  %v82_v3 = vld [vmem:[#allocation5] sm:$0xff]  ;;  %v737_v5 = vld [vmem:[#allocation2 + $0x30] sm:$0xff]  ;;  %vm315_vm2 = vcmask 1042434   ;;  %vm317_vm3 = vcmask 1043459   ;;  %vm319_vm4 = vcmask 1044484  }
  0x11   :  { %v735_v4 = vld [vmem:[#allocation2] sm:$0xff]  ;;  %v743_v6 = vld [vmem:[#allocation2 + $0x8] sm:$0xff]  ;;  %v745_v7 = vld [vmem:[#allocation2 + $0x38] sm:$0xff]  ;;  %vm321_vm5 = vcmask 1045509   ;;  %vm323_vm6 = vcmask 1046534   ;;  %vm325_vm7 = vcmask 1047559  }
  0x12   :  { %124 = vmatpush.msra.mxu0 %v84_v1  ;;  %521 = vmatpush.msra.mxu3 %v84_v1  ;;  %v208_v8 = vld [vmem:[#allocation7 + $0x78] sm:$0xff]  ;;  %v207_v9 = vld [vmem:[#allocation7 + $0x70] sm:$0xff]  ;;  %v206_v10 = vld [vmem:[#allocation7 + $0x68] sm:$0xff]  ;;  %vm329_vm8 = vcmask 64512  }
  0x13   :  { %213 = vmatpush.msra.mxu1 %v208_v8  ;;  %524 = vmatpush.msra.mxu2 %v208_v8  ;;  %v205_v11 = vld [vmem:[#allocation7 + $0x60] sm:$0xff]  ;;  %v751_v12 = vld [vmem:[#allocation2 + $0x10] sm:$0xff]  ;;  %v204_v13 = vld [vmem:[#allocation7 + $0x58] sm:$0xff] }
  0x14   :  { %125 = vmatpush.msra.mxu0 %v83_v2  ;;  %522 = vmatpush.msra.mxu3 %v83_v2  ;;  %v203_v14 = vld [vmem:[#allocation7 + $0x50] sm:$0xff]  ;;  %v202_v15 = vld [vmem:[#allocation7 + $0x48] sm:$0xff]  ;;  %v201_v16 = vld [vmem:[#allocation7 + $0x40] sm:$0xff] }
  0x15   :  { %214 = vmatpush.msra.mxu1 %v207_v9  ;;  %526 = vmatpush.msra.mxu2 %v207_v9  ;;  %v755_v17 = vld [vmem:[#allocation2 + $0x18] sm:$0xff]  ;;  %v199_v19 = vld [vmem:[#allocation7 + $0x30] sm:$0xff]  ;;  %v198_v20 = vld [vmem:[#allocation7 + $0x28] sm:$0xff] }
  0x16   :  { %126 = vmatpush.msra.mxu0 %v82_v3  ;;  %523 = vmatpush.msra.mxu3 %v82_v3  ;;  %v200_v18 = vld [vmem:[#allocation7 + $0x38] sm:$0xff]  ;;  %v197_v21 = vld [vmem:[#allocation7 + $0x20] sm:$0xff]  ;;  %v763_v24 = vld [vmem:[#allocation2 + $0x28] sm:$0xff] }
  0x17   :  { %512 = vmatmul.msk.f32.vlgmr.msra.gmra.mxu0 %vm86_vm0, %v735_v4  ;;  %518 = vmatmul.msk.f32.vlgmr.msra.gmra.mxu3 %vm86_vm0, %v737_v5  ;;  %v759_v22 = vld [vmem:[#allocation2 + $0x20] sm:$0xff]  ;;  %v196_v23 = vld [vmem:[#allocation7 + $0x18] sm:$0xff]  ;;  %v195_v25 = vld [vmem:[#allocation7 + $0x10] sm:$0xff] }
  0x18   :  { %525 = vmatpush.msrb.mxu3 %v208_v8  ;;  %215 = vmatpush.msra.mxu1 %v206_v10  ;;  %v194_v26 = vld [vmem:[#allocation7 + $0x8] sm:$0xff]  ;;  %v193_v27 = vld [vmem:[#allocation7] sm:$0xff] }
  0x19   :  { %528 = vmatpush.msra.mxu2 %v206_v10  ;;  %v152_v28 = vld [vmem:[%s817_s2] sm:$0xff] }
  0x1a   :  { %527 = vmatpush.msrb.mxu3 %v207_v9  ;;  %216 = vmatpush.msra.mxu1 %v205_v11  ;;  %v161_v29 = vperm.slane %v152_v28, 0  ;;  %v159_v30 = vrot.slane %v152_v28, 6  ;;  %v154_v33 = vrot.slane %v152_v28, 1  ;;  %v160_v39 = vrot.slane %v152_v28, 7  ;;  %v569_v8 = vld [vmem:[%s820_s5] ss:$0 sm:$0xff] }
  0x1b   :  { %530 = vmatpush.msra.mxu2 %v205_v11  ;;  %v155_v42 = vrot.slane %v152_v28, 2  ;;  %v156_v51 = vrot.slane %v152_v28, 3  ;;  %v157_v57 = vrot.slane %v152_v28, 4  ;;  %v158_v62 = vrot.slane %v152_v28, 5 }
  0x1c   :  { %529 = vmatpush.msrb.mxu3 %v206_v10  ;;  %217 = vmatpush.msra.mxu1 %v204_v13  ;;  %v167_v35 = vperm.slane %v159_v30, 0  ;;  %v162_v36 = vperm.slane %v154_v33, 0  ;;  %v168_v45 = vperm.slane %v160_v39, 0  ;;  %v682_v30 = vmov 0  }
  0x1d   :  { %532 = vmatpush.msra.mxu2 %v204_v13  ;;  %v163_v46 = vperm.slane %v155_v42, 0  ;;  %v164_v54 = vperm.slane %v156_v51, 0  ;;  %v165_v59 = vperm.slane %v157_v57, 0  ;;  %v166_v0 = vperm.slane %v158_v62, 0  ;;  %565 = vset.pattern.permute.xlu2 %v682_v30 }
  0x1e   :  { %531 = vmatpush.msrb.mxu3 %v205_v11  ;;  %218 = vmatpush.msra.mxu1 %v203_v14  ;;  %v570_v11 = vld [vmem:[%s821_s6] ss:$0 sm:$0xff] }
  0x1f   :  { %513 = vmatmul.msk.f32.gmra.mxu0 %vm86_vm0, %v743_v6  ;;  %519 = vmatmul.msk.f32.gmra.mxu3 %vm86_vm0, %v745_v7 }
  0x20   :  { %533 = vmatpush.msrb.mxu3 %v204_v13  ;;  %534 = vmatpush.msra.mxu2 %v203_v14 }
  0x21   :  { %219 = vmatpush.msra.mxu1 %v202_v15 }
  0x22   :  { %535 = vmatpush.msrb.mxu3 %v203_v14  ;;  %536 = vmatpush.msra.mxu2 %v202_v15 }
  0x23   :  { %220 = vmatpush.msra.mxu1 %v201_v16 }
  0x24   :  { %537 = vmatpush.msrb.mxu3 %v202_v15  ;;  %538 = vmatpush.msra.mxu2 %v201_v16 }
  0x25   :  { %221 = vmatpush.msra.mxu1 %v200_v18 }
  0x26   :  { %539 = vmatpush.msrb.mxu3 %v201_v16  ;;  %540 = vmatpush.msra.mxu2 %v200_v18 }
  0x27   :  { %514 = vmatmul.msk.f32.gmra.mxu0 %vm86_vm0, %v751_v12  ;;  %222 = vmatpush.msra.mxu1 %v199_v19 }
  0x28   :  { %541 = vmatpush.msrb.mxu3 %v200_v18  ;;  %542 = vmatpush.msra.mxu2 %v199_v19 }
  0x29   :  { %223 = vmatpush.msra.mxu1 %v198_v20 }
  0x2a   :  { %543 = vmatpush.msrb.mxu3 %v199_v19  ;;  %544 = vmatpush.msra.mxu2 %v198_v20 }
  0x2b   :  { %224 = vmatpush.msra.mxu1 %v197_v21 }
  0x2c   :  { %545 = vmatpush.msrb.mxu3 %v198_v20  ;;  %546 = vmatpush.msra.mxu2 %v197_v21 }
  0x2d   :  { %225 = vmatpush.msra.mxu1 %v196_v23 }
  0x2e   :  { %547 = vmatpush.msrb.mxu3 %v197_v21  ;;  %548 = vmatpush.msra.mxu2 %v196_v23 }
  0x2f   :  { %515 = vmatmul.msk.f32.gmra.mxu0 %vm86_vm0, %v755_v17  ;;  %226 = vmatpush.msra.mxu1 %v195_v25 }
  0x30   :  { %549 = vmatpush.msrb.mxu3 %v196_v23  ;;  %550 = vmatpush.msra.mxu2 %v195_v25 }
  0x31   :  { %227 = vmatpush.msra.mxu1 %v194_v26 }
  0x32   :  { %551 = vmatpush.msrb.mxu3 %v195_v25  ;;  %552 = vmatpush.msra.mxu2 %v194_v26 }
  0x33   :  { %228 = vmatpush.msra.mxu1 %v193_v27 }
  0x34   :  { %553 = vmatpush.msrb.mxu3 %v194_v26  ;;  %554 = vmatpush.msra.mxu2 %v193_v27 }
  0x36   :  { %555 = vmatpush.msrb.mxu3 %v193_v27 }
  0x37   :  { %516 = vmatmul.msk.f32.gmra.mxu0 %vm86_vm0, %v759_v22 }
  0x3f   :  { %517 = vmatmul.msk.f32.gmra.mxu0 %vm86_vm0, %v763_v24 }
  0x94   :  { %v128_v31 = vpop.f32.mrf.mxu0 }
  0x95   :  { %v177_v32 = vadd.f32 %v161_v29, %v128_v31 }
  0x97   :  { %v185_v34 = vmax.f32 %v177_v32, 0.0 }
  0x99   :  { %229 = vmatmul.f32.vlgmr.msra.gmra.mxu1 %v185_v34 }
  0x9a   :  { %v146_v37 = vpop.f32.mrf.mxu3 }
  0x9b   :  { %v183_v38 = vadd.f32 %v167_v35, %v146_v37 }
  0x9c   :  { %v131_v40 = vpop.f32.mrf.mxu0 }
  0x9d   :  { %v178_v41 = vadd.f32 %v162_v36, %v131_v40  ;;  %v191_v43 = vmax.f32 %v183_v38, 0.0 }
  0x9f   :  { %v186_v44 = vmax.f32 %v178_v41, 0.0  ;;  %247 = vmatmul.f32.vlgmr.msrb.gmra.mxu3 %v191_v43 }
  0xa1   :  { %232 = vmatmul.f32.gmra.mxu1 %v186_v44 }
  0xa2   :  { %v149_v47 = vpop.f32.mrf.mxu3 }
  0xa3   :  { %v184_v48 = vadd.f32 %v168_v45, %v149_v47  ;;  %v292_v47 = vld [vmem:[%s815_s0] sm:$0xff] }
  0xa4   :  { %v134_v49 = vpop.f32.mrf.mxu0 }
  0xa5   :  { %v179_v50 = vadd.f32 %v163_v46, %v134_v49  ;;  %v192_v52 = vmax.f32 %v184_v48, 0.0 }
  0xa7   :  { %v187_v53 = vmax.f32 %v179_v50, 0.0  ;;  %250 = vmatmul.f32.gmra.mxu3 %v192_v52  ;;  %v290_v50 = vlaneseq }
  0xa9   :  { %235 = vmatmul.f32.gmra.mxu1 %v187_v53  ;;  %v291_v53 = vand.u32 127, %v290_v50 }
  0xac   :  { %v137_v55 = vpop.f32.mrf.mxu0 }
  0xad   :  { %v180_v56 = vadd.f32 %v164_v54, %v137_v55 }
  0xaf   :  { %v188_v58 = vmax.f32 %v180_v56, 0.0 }
  0xb1   :  { %238 = vmatmul.f32.vlgmr.msra.gmra.mxu2 %v188_v58 }
  0xb4   :  { %v140_v60 = vpop.f32.mrf.mxu0 }
  0xb5   :  { %v181_v61 = vadd.f32 %v165_v59, %v140_v60 }
  0xb7   :  { %v189_v63 = vmax.f32 %v181_v61, 0.0 }
  0xb9   :  { %241 = vmatmul.f32.gmra.mxu2 %v189_v63 }
  0xbc   :  { %v143_v1 = vpop.f32.mrf.mxu0 }
  0xbd   :  { %v182_v2 = vadd.f32 %v166_v0, %v143_v1 }
  0xbf   :  { %v190_v3 = vmax.f32 %v182_v2, 0.0 }
  0xc1   :  { %244 = vmatmul.f32.gmra.mxu2 %v190_v3 }
 0x116   :  { %v230_v9 = vpop.f32.mrf.mxu1 }
 0x117   :  { %v231_v10 = vadd.f32 %v569_v8, %v230_v9 }
 0x119   :  { %v254_v13 = vmax.f32 %v231_v10, 0.0 }
 0x11b   :  { %v266_v14 = vmul.f32 %v570_v11, %v254_v13 }
 0x11d   :  { %274 = vadd.xlane.f32.xlu0 %v266_v14 }
 0x11e   :  { %v233_v15 = vpop.f32.mrf.mxu1 }
 0x11f   :  { %v234_v16 = vadd.f32 %v569_v8, %v233_v15 }
 0x121   :  { %v255_v18 = vmax.f32 %v234_v16, 0.0 }
 0x122   :  { %v248_v19 = vpop.f32.mrf.mxu3 }
 0x123   :  { %v267_v20 = vmul.f32 %v570_v11, %v255_v18  ;;  %v249_v21 = vadd.f32 %v569_v8, %v248_v19 }
 0x125   :  { %276 = vadd.xlane.f32.xlu0 %v267_v20  ;;  %v260_v23 = vmax.f32 %v249_v21, 0.0 }
 0x126   :  { %v236_v25 = vpop.f32.mrf.mxu1 }
 0x127   :  { %v237_v26 = vadd.f32 %v569_v8, %v236_v25  ;;  %v272_v28 = vmul.f32 %v570_v11, %v260_v23  ;;  %v357_v25 = vshrl.u32 %v290_v50, 7 }
 0x129   :  { %v256_v27 = vmax.f32 %v237_v26, 0.0  ;;  %567 = vset.pattern.permute.xlu1 %v357_v25  ;;  %566 = vset.pattern.permute.xlu0 %v357_v25 }
 0x12a   :  { %v251_v32 = vpop.f32.mrf.mxu3 }
 0x12b   :  { %v268_v29 = vmul.f32 %v570_v11, %v256_v27  ;;  %v252_v35 = vadd.f32 %v569_v8, %v251_v32 }
 0x12d   :  { %278 = vadd.xlane.f32.xlu1 %v268_v29  ;;  %286 = vadd.xlane.f32.xlu0 %v272_v28  ;;  %v261_v37 = vmax.f32 %v252_v35, 0.0 }
 0x12f   :  { %v273_v41 = vmul.f32 %v570_v11, %v261_v37 }
 0x134   :  { %v239_v31 = vpop.f32.mrf.mxu2 }
 0x135   :  { %v240_v33 = vadd.f32 %v569_v8, %v239_v31 }
 0x137   :  { %v257_v34 = vmax.f32 %v240_v33, 0.0 }
 0x139   :  { %v269_v36 = vmul.f32 %v570_v11, %v257_v34 }
 0x13b   :  { %280 = vadd.xlane.f32.xlu1 %v269_v36 }
 0x13c   :  { %v242_v38 = vpop.f32.mrf.mxu2 }
 0x13d   :  { %v243_v39 = vadd.f32 %v569_v8, %v242_v38 }
 0x13f   :  { %v258_v40 = vmax.f32 %v243_v39, 0.0 }
 0x141   :  { %v270_v42 = vmul.f32 %v570_v11, %v258_v40 }
 0x143   :  { %282 = vadd.xlane.f32.xlu2 %v270_v42  ;;  %288 = vadd.xlane.f32.xlu1 %v273_v41 }
 0x144   :  { %v245_v43 = vpop.f32.mrf.mxu2 }
 0x145   :  { %v246_v44 = vadd.f32 %v569_v8, %v245_v43 }
 0x147   :  { %v259_v45 = vmax.f32 %v246_v44, 0.0 }
 0x149   :  { %v271_v46 = vmul.f32 %v570_v11, %v259_v45 }
 0x14b   :  { %284 = vadd.xlane.f32.xlu2 %v271_v46 }
 0x163   :  { %294 = vperm.xlu2 %565, %v292_v47  }
 0x16b   :  { %568 = vset.pattern.permute.xlu2 %v357_v25 }
 0x190   :  { %v275_v48 = vpop.xlane.xlu0 %274 }
 0x191   :  { %v305_v57 = vperm.slane %v275_v48, %v291_v53 }
 0x198   :  { %v277_v51 = vpop.xlane.xlu0 %276 }
 0x199   :  { %v306_v55 = vperm.slane %v277_v51, %v291_v53 }
 0x19b   :  { %v314_v60 = vsel %vm313_vm1, %v306_v55, %v305_v57 }
 0x1a0   :  { %v279_v49 = vpop.xlane.xlu1 %278  ;;  %v287_v0 = vpop.xlane.xlu0 %286 }
 0x1a1   :  { %v307_v56 = vperm.slane %v279_v49, %v291_v53  ;;  %v311_v9 = vperm.slane %v287_v0, %v291_v53 }
 0x1a3   :  { %v316_v61 = vsel %vm315_vm2, %v307_v56, %v314_v60 }
 0x1ae   :  { %v281_v54 = vpop.xlane.xlu1 %280 }
 0x1af   :  { %v308_v58 = vperm.slane %v281_v54, %v291_v53 }
 0x1b1   :  { %v318_v63 = vsel %vm317_vm3, %v308_v58, %v316_v61 }
 0x1b6   :  { %v283_v52 = vpop.xlane.xlu2 %282  ;;  %v289_v3 = vpop.xlane.xlu1 %288 }
 0x1b7   :  { %v309_v59 = vperm.slane %v283_v52, %v291_v53  ;;  %v312_v10 = vperm.slane %v289_v3, %v291_v53 }
 0x1b9   :  { %v320_v2 = vsel %vm319_vm4, %v309_v59, %v318_v63 }
 0x1be   :  { %v285_v62 = vpop.xlane.xlu2 %284 }
 0x1bf   :  { %v310_v1 = vperm.slane %v285_v62, %v291_v53 }
 0x1c1   :  { %v322_v8 = vsel %vm321_vm5, %v310_v1, %v320_v2 }
 0x1c2   :  { %v324_v11 = vsel %vm323_vm6, %v311_v9, %v322_v8 }
 0x1c3   :  { %v326_v14 = vsel %vm325_vm7, %v312_v10, %v324_v11 }
 0x1c6   :  { %v295_v13 = vpop.permute.xlu2 %294 }
 0x1c7   :  { %vm296_vm9 = vcmp.ge.s32.totalorder %v291_v53, %v295_v13 }
 0x1c8   :  { %v328_v15 = vsel %vm296_vm9, -1e+30, %v326_v14 }
 0x1c9   :  { %v330_v16 = vsel %vm329_vm8, %v328_v15, -inf }
 0x1ca   :  { %331 = vmax.xlane.f32.xlu0 %v330_v16 }
 0x23d   :  { %v332_v18 = vpop.xlane.xlu0 %331 }
 0x23e   :  { %v333_v19 = vsub.f32 %v328_v15, %v332_v18 }
 0x240   :  { %v334_v20 = vmul.f32 1.442695, %v333_v19 }
 0x242   :  { %571 = vpow2.f32 %v334_v20 }
 0x248   :  { %v572_v21 = vpop.eup %571 }
 0x249   :  { %v336_v23 = vsel %vm329_vm8, %v572_v21, 0.0 }
 0x24a   :  { %337 = vadd.xlane.f32.xlu1 %v336_v23 }
 0x2bd   :  { %v338_v26 = vpop.xlane.xlu1 %337 }
 0x2be   :  { %573 = vrcp.f32 %v338_v26  ;;  %v350_v30 = vand.u32 2147483648, %v338_v26  ;;  %v348_v32 = vand.u32 2147483647, %v338_v26  ;;  %vm344_vm11 = vweird.f32 %v338_v26 }
 0x2c0   :  { %v351_v34 = vor.u32 1.1754944e-38, %v350_v30  ;;  %vm349_vm13 = vcmp.eq.f32.partialorder %v348_v32, 8.507059e+37 }
 0x2c4   :  { %v574_v27 = vpop.eup %573 }
 0x2c5   :  { %v340_v28 = vmul.f32 %v574_v27, %v338_v26  ;;  %vm345_vm10 = vweird.f32 %v574_v27 }
 0x2c6   :  { %vm346_vm12 = vmor %vm344_vm11, %vm345_vm10 }
 0x2c7   :  { %v341_v29 = vsub.f32 1.0, %v340_v28 }
 0x2c9   :  { %v342_v31 = vmul.f32 %v574_v27, %v341_v29 }
 0x2cb   :  { %v343_v33 = vadd.f32 %v574_v27, %v342_v31 }
 0x2cd   :  { %v347_v35 = vsel %vm346_vm12, %v574_v27, %v343_v33 }
 0x2ce   :  { %v352_v36 = vsel %vm349_vm13, %v351_v34, %v347_v35 }
 0x2cf   :  { %v353_v37 = vmul.f32 %v572_v21, %v352_v36 }
 0x2d1   :  { %v354_v38 = vsel %vm296_vm9, 0.0, %v353_v37 }
 0x2d2   :  { %v369_v39 = vperm.slane %v354_v38, 2  ;;  %v362_v40 = vperm.slane %v354_v38, 1  ;;  %v355_v41 = vperm.slane %v354_v38, 0  ;;  %v376_v42 = vperm.slane %v354_v38, 3 }
 0x2d3   :  { %v390_v43 = vperm.slane %v354_v38, 5  ;;  %v383_v44 = vperm.slane %v354_v38, 4  ;;  %v404_v45 = vperm.slane %v354_v38, 7  ;;  %v397_v46 = vperm.slane %v354_v38, 6 }
 0x2d4   :  { %374 = vperm.xlu2 %568, %v369_v39   ;;  %367 = vperm.xlu1 %567, %v362_v40  }
 0x2d5   :  { %360 = vperm.xlu0 %566, %v355_v41  }
 0x2dc   :  { %381 = vperm.xlu2 %568, %v376_v42   ;;  %395 = vperm.xlu1 %567, %v390_v43  }
 0x2e4   :  { %388 = vperm.xlu2 %568, %v383_v44   ;;  %409 = vperm.xlu1 %567, %v404_v45  }
 0x2ec   :  { %402 = vperm.xlu2 %568, %v397_v46  }
 0x32e   :  { %v375_v47 = vpop.permute.xlu2 %374 }
 0x32f   :  { %v413_v49 = vmul.f32 %v375_v47, %v751_v12 }
 0x331   :  { %v433_v52 = vsel %vm86_vm0, %v413_v49, 0.0 }
 0x332   :  { %v434_v54 = vrot.slane %v433_v52, 4 }
 0x336   :  { %v382_v48 = vpop.permute.xlu2 %381 }
 0x337   :  { %v414_v51 = vmul.f32 %v382_v48, %v755_v17  ;;  %v435_v17 = vadd.f32 %v434_v54, %v433_v52 }
 0x339   :  { %v440_v55 = vsel %vm86_vm0, %v414_v51, 0.0  ;;  %v436_v9 = vrot.slane %v435_v17, 2 }
 0x33a   :  { %v441_v60 = vrot.slane %v440_v55, 4 }
 0x33b   :  { %v437_v19 = vadd.f32 %v436_v9, %v435_v17 }
 0x33c   :  { %v442_v3 = vadd.f32 %v441_v60, %v440_v55 }
 0x33d   :  { %v438_v32 = vrot.slane %v437_v19, 1 }
 0x33e   :  { %v389_v50 = vpop.permute.xlu2 %388  ;;  %v443_v16 = vrot.slane %v442_v3, 2 }
 0x33f   :  { %v415_v53 = vmul.f32 %v389_v50, %v759_v22  ;;  %v439_v41 = vadd.f32 %v438_v32, %v437_v19 }
 0x340   :  { %v444_v29 = vadd.f32 %v443_v16, %v442_v3 }
 0x341   :  { %v447_v61 = vsel %vm86_vm0, %v415_v53, 0.0 }
 0x342   :  { %v448_v1 = vrot.slane %v447_v61, 4  ;;  %v445_v38 = vrot.slane %v444_v29, 1 }
 0x344   :  { %v449_v14 = vadd.f32 %v448_v1, %v447_v61  ;;  %v446_v48 = vadd.f32 %v445_v38, %v444_v29 }
 0x346   :  { %v403_v56 = vpop.permute.xlu2 %402  ;;  %v368_v57 = vpop.permute.xlu1 %367  ;;  %v450_v26 = vrot.slane %v449_v14, 2 }
 0x347   :  { %v412_v58 = vmul.f32 %v368_v57, %v743_v6  ;;  %v361_v59 = vpop.permute.xlu0 %360  ;;  %v417_v12 = vmul.f32 %v403_v56, %v737_v5 }
 0x348   :  { %v411_v62 = vmul.f32 %v361_v59, %v735_v4  ;;  %v451_v36 = vadd.f32 %v450_v26, %v449_v14 }
 0x349   :  { %v426_v63 = vsel %vm86_vm0, %v412_v58, 0.0  ;;  %v461_v8 = vsel %vm86_vm0, %v417_v12, 0.0 }
 0x34a   :  { %v427_v0 = vrot.slane %v426_v63, 4  ;;  %v419_v22 = vsel %vm86_vm0, %v411_v62, 0.0  ;;  %v462_v5 = vrot.slane %v461_v8, 4  ;;  %v452_v45 = vrot.slane %v451_v36, 1 }
 0x34b   :  { %v420_v2 = vrot.slane %v419_v22, 4 }
 0x34c   :  { %v428_v6 = vadd.f32 %v427_v0, %v426_v63  ;;  %v463_v27 = vadd.f32 %v462_v5, %v461_v8 }
 0x34d   :  { %v421_v10 = vadd.f32 %v420_v2, %v419_v22 }
 0x34e   :  { %v429_v11 = vrot.slane %v428_v6, 2  ;;  %v396_v13 = vpop.permute.xlu1 %395 }
 0x34f   :  { %v422_v15 = vrot.slane %v421_v10, 2  ;;  %v416_v4 = vmul.f32 %v396_v13, %v763_v24  ;;  %v464_v24 = vrot.slane %v463_v27, 2 }
 0x350   :  { %v430_v18 = vadd.f32 %v429_v11, %v428_v6 }
 0x351   :  { %v423_v20 = vadd.f32 %v422_v15, %v421_v10  ;;  %v454_v21 = vsel %vm86_vm0, %v416_v4, 0.0  ;;  %v465_v46 = vadd.f32 %v464_v24, %v463_v27 }
 0x352   :  { %v431_v23 = vrot.slane %v430_v18, 1  ;;  %v455_v25 = vrot.slane %v454_v21, 4 }
 0x353   :  { %v424_v28 = vrot.slane %v423_v20, 1  ;;  %v466_v53 = vrot.slane %v465_v46, 1 }
 0x354   :  { %v432_v30 = vadd.f32 %v431_v23, %v430_v18  ;;  %v456_v31 = vadd.f32 %v455_v25, %v454_v21 }
 0x355   :  { %v425_v33 = vadd.f32 %v424_v28, %v423_v20  ;;  %v467_v58 = vadd.f32 %v466_v53, %v465_v46 }
 0x356   :  { %v457_v34 = vrot.slane %v456_v31, 2  ;;  %v410_v35 = vpop.permute.xlu1 %409 }
 0x357   :  { %v418_v37 = vmul.f32 %v410_v35, %v745_v7  ;;  %v483_v39 = vsel %vm313_vm1, %v432_v30, %v425_v33  ;;  %v453_v7 = vadd.f32 %v452_v45, %v451_v36 }
 0x358   :  { %v458_v40 = vadd.f32 %v457_v34, %v456_v31  ;;  %v484_v47 = vsel %vm315_vm2, %v439_v41, %v483_v39 }
 0x359   :  { %v468_v42 = vsel %vm86_vm0, %v418_v37, 0.0  ;;  %v485_v51 = vsel %vm317_vm3, %v446_v48, %v484_v47 }
 0x35a   :  { %v459_v43 = vrot.slane %v458_v40, 1  ;;  %v469_v44 = vrot.slane %v468_v42, 4  ;;  %v486_v55 = vsel %vm319_vm4, %v453_v7, %v485_v51 }
 0x35c   :  { %v470_v49 = vadd.f32 %v469_v44, %v468_v42  ;;  %v460_v50 = vadd.f32 %v459_v43, %v458_v40 }
 0x35e   :  { %v471_v52 = vrot.slane %v470_v49, 2  ;;  %v487_v56 = vsel %vm321_vm5, %v460_v50, %v486_v55 }
 0x35f   :  { %v488_v60 = vsel %vm323_vm6, %v467_v58, %v487_v56 }
 0x360   :  { %v472_v54 = vadd.f32 %v471_v52, %v470_v49 }
 0x362   :  { %v473_v57 = vrot.slane %v472_v54, 1 }
 0x364   :  { %v474_v59 = vadd.f32 %v473_v57, %v472_v54 }
 0x366   :  { %v489_v61 = vsel %vm325_vm7, %v474_v59, %v488_v60 }
 0x367   :  { %491 = vst.msk [vmem:[#allocation8] sm:$0xff] %vm86_vm0, %v489_v61 }
 0x368   :  { %495 = vsyncadd [#allocation4], 96  ;;  %s498_s21 = sshll.u32 %s822_s7, 4  ;;  %s683_s22 = smov [#allocation8]   ;;  %s499_s21 = int_to_ptr.hbm [resolvable:$true] %s498_s21 }
 0x369   :  { %s496_s23 = sshll.u32 %s683_s22, 4  ;;  %s684_s24 = smov 32   ;;  %s497_s23 = int_to_ptr.vmem [resolvable:$true] %s496_s23 }
 0x36a   :  { %s685_s25 = smov 2  }
 0x36b   :  { %504 = dma.vmem_to_hbm [thread:$0]  %s497_s23, 32, %s499_s21, [#allocation4], %s684_s24, %s684_s24, %s685_s25  }
 0x36c   :  { %675 = dma.done.wait [#allocation4], 128  }
 0x36d   :  { %676 = vsyncadd [#allocation4], 4294967168 }
 0x36e   :  { %509 = vsyncpa [#allocation3], 1 }
 0x36f   :  { %510 = vsyncpa [#allocation6], 1 }
 0x370   :  { %511 = vsyncpa [#allocation4], 1 }

// kernel: tpu_custom_call.1
= control target key start
LH: loop header
LB: loop body
LE: loop exit
PB: predicated region body
PF: predicated region fallthrough
CT: control target
= control target key end

     0   :  { %12 = vsyncpa [#allocation3], 0  ;;  %s815_s0 = inlined_call_operand.vmem [shape: s32[2,1], index: 0, kind: input, shape index: {}]   ;;  %s816_s1 = inlined_call_operand.hbm [shape: f32[2,8,32], index: 1, kind: input, shape index: {}]   ;;  %s817_s2 = inlined_call_operand.vmem [shape: f32[2,128], index: 2, kind: input, shape index: {}]   ;;  %s818_s3 = inlined_call_operand.hbm [shape: f32[32,128], index: 3, kind: input, shape index: {}]   ;;  %s819_s4 = inlined_call_operand.hbm [shape: f32[128,128], index: 4, kind: input, shape index: {}]   ;;  %s820_s5 = inlined_call_operand.vmem [shape: f32[1,128], index: 5, kind: input, shape index: {}]   ;;  %s821_s6 = inlined_call_operand.vmem [shape: f32[1,128], index: 6, kind: input, shape index: {}]   ;;  %s822_s7 = inlined_call_operand.hbm [shape: f32[2,32], index: 7, kind: output, shape index: {}]  }
   0x1   :  { %13 = vsyncpa [#allocation6], 0 }
   0x2   :  { %14 = vsyncpa [#allocation4], 0 }
   0x3   :  { %20 = vsyncadd [#allocation3], 768  ;;  %s36_s26 = sshll.u32 %s818_s3, 4  ;;  %s677_s27 = smov [#allocation5]   ;;  %s37_s26 = int_to_ptr.hbm [resolvable:$true] %s36_s26 }
   0x4   :  { %s38_s28 = sshll.u32 %s677_s27, 4  ;;  %s21_s8 = sshll.u32 %s816_s1, 4  ;;  %s39_s28 = int_to_ptr.vmem [resolvable:$true] %s38_s28  ;;  %s22_s8 = int_to_ptr.hbm [resolvable:$true] %s21_s8 }
   0x5   :  { %s678_s9 = smov 128   ;;  %s679_s10 = smov 8  }
   0x6   :  { %44 = dma.hbm_to_vmem [thread:$0]  %s37_s26, 512, %s39_s28, [#allocation6], %s678_s9, %s678_s9, %s679_s10  }
   0x7   :  { %s680_s11 = smov [#allocation2]   ;;  %s49_s15 = sshll.u32 %s819_s4, 4  ;;  %s50_s15 = int_to_ptr.hbm [resolvable:$true] %s49_s15 }
   0x8   :  { %s23_s12 = sshll.u32 %s680_s11, 4  ;;  %s681_s3 = smov [#allocation7]   ;;  %s24_s12 = int_to_ptr.vmem [resolvable:$true] %s23_s12 }
   0x9   :  { %29 = dma.hbm_to_vmem [thread:$0]  %s22_s8, 256, %s24_s12, [#allocation3], %s678_s9, %s678_s9, %s679_s10  }
   0xa   :  { %s51_s16 = sshll.u32 %s681_s3, 4  ;;  %s52_s16 = int_to_ptr.vmem [resolvable:$true] %s51_s16 }
   0xb   :  { %57 = dma.hbm_to_vmem [thread:$0]  %s50_s15, 2048, %s52_s16, [#allocation6], %s678_s9, %s678_s9, %s679_s10  }
   0xc   :  { %671 = dma.done.wait [#allocation3], 1024  }
   0xd   :  { %672 = vsyncadd [#allocation3], 4294966272 }
   0xe   :  { %673 = dma.done.wait [#allocation6], 2560  }
   0xf   :  { %674 = vsyncadd [#allocation6], 4294964736  ;;  %v85_v0 = vld [vmem:[#allocation5 + $0x18] sm:$0xff]  ;;  %v84_v1 = vld [vmem:[#allocation5 + $0x10] sm:$0xff]  ;;  %vm86_vm0 = vcmask 261120   ;;  %vm313_vm1 = vcmask 1041409  }
  0x10   :  { %123 = vmatpush.msra.mxu0 %v85_v0  ;;  %520 = vmatpush.msra.mxu3 %v85_v0  ;;  %v83_v2 = vld [vmem:[#allocation5 + $0x8] sm:$0xff]  ;;  %v82_v3 = vld [vmem:[#allocation5] sm:$0xff]  ;;  %v737_v5 = vld [vmem:[#allocation2 + $0x30] sm:$0xff]  ;;  %vm315_vm2 = vcmask 1042434   ;;  %vm317_vm3 = vcmask 1043459   ;;  %vm319_vm4 = vcmask 1044484  }
  0x11   :  { %v735_v4 = vld [vmem:[#allocation2] sm:$0xff]  ;;  %v743_v6 = vld [vmem:[#allocation2 + $0x8] sm:$0xff]  ;;  %v745_v7 = vld [vmem:[#allocation2 + $0x38] sm:$0xff]  ;;  %vm321_vm5 = vcmask 1045509   ;;  %vm323_vm6 = vcmask 1046534   ;;  %vm325_vm7 = vcmask 1047559  }
  0x12   :  { %124 = vmatpush.msra.mxu0 %v84_v1  ;;  %521 = vmatpush.msra.mxu3 %v84_v1  ;;  %v208_v8 = vld [vmem:[#allocation7 + $0x78] sm:$0xff]  ;;  %v207_v9 = vld [vmem:[#allocation7 + $0x70] sm:$0xff]  ;;  %v206_v10 = vld [vmem:[#allocation7 + $0x68] sm:$0xff]  ;;  %vm329_vm8 = vcmask 64512  }
  0x13   :  { %213 = vmatpush.msra.mxu1 %v208_v8  ;;  %524 = vmatpush.msra.mxu2 %v208_v8  ;;  %v205_v11 = vld [vmem:[#allocation7 + $0x60] sm:$0xff]  ;;  %v751_v12 = vld [vmem:[#allocation2 + $0x10] sm:$0xff]  ;;  %v204_v13 = vld [vmem:[#allocation7 + $0x58] sm:$0xff] }
  0x14   :  { %125 = vmatpush.msra.mxu0 %v83_v2  ;;  %522 = vmatpush.msra.mxu3 %v83_v2  ;;  %v203_v14 = vld [vmem:[#allocation7 + $0x50] sm:$0xff]  ;;  %v202_v15 = vld [vmem:[#allocation7 + $0x48] sm:$0xff]  ;;  %v201_v16 = vld [vmem:[#allocation7 + $0x40] sm:$0xff] }
  0x15   :  { %214 = vmatpush.msra.mxu1 %v207_v9  ;;  %526 = vmatpush.msra.mxu2 %v207_v9  ;;  %v755_v17 = vld [vmem:[#allocation2 + $0x18] sm:$0xff]  ;;  %v199_v19 = vld [vmem:[#allocation7 + $0x30] sm:$0xff]  ;;  %v198_v20 = vld [vmem:[#allocation7 + $0x28] sm:$0xff] }
  0x16   :  { %126 = vmatpush.msra.mxu0 %v82_v3  ;;  %523 = vmatpush.msra.mxu3 %v82_v3  ;;  %v200_v18 = vld [vmem:[#allocation7 + $0x38] sm:$0xff]  ;;  %v197_v21 = vld [vmem:[#allocation7 + $0x20] sm:$0xff]  ;;  %v763_v24 = vld [vmem:[#allocation2 + $0x28] sm:$0xff] }
  0x17   :  { %512 = vmatmul.msk.f32.vlgmr.msra.gmra.mxu0 %vm86_vm0, %v735_v4  ;;  %518 = vmatmul.msk.f32.vlgmr.msra.gmra.mxu3 %vm86_vm0, %v737_v5  ;;  %v759_v22 = vld [vmem:[#allocation2 + $0x20] sm:$0xff]  ;;  %v196_v23 = vld [vmem:[#allocation7 + $0x18] sm:$0xff]  ;;  %v195_v25 = vld [vmem:[#allocation7 + $0x10] sm:$0xff] }
  0x18   :  { %525 = vmatpush.msrb.mxu3 %v208_v8  ;;  %215 = vmatpush.msra.mxu1 %v206_v10  ;;  %v194_v26 = vld [vmem:[#allocation7 + $0x8] sm:$0xff]  ;;  %v193_v27 = vld [vmem:[#allocation7] sm:$0xff] }
  0x19   :  { %528 = vmatpush.msra.mxu2 %v206_v10  ;;  %v152_v28 = vld [vmem:[%s817_s2] sm:$0xff] }
  0x1a   :  { %527 = vmatpush.msrb.mxu3 %v207_v9  ;;  %216 = vmatpush.msra.mxu1 %v205_v11  ;;  %v161_v29 = vperm.slane %v152_v28, 0  ;;  %v159_v30 = vrot.slane %v152_v28, 6  ;;  %v154_v33 = vrot.slane %v152_v28, 1  ;;  %v160_v39 = vrot.slane %v152_v28, 7  ;;  %v569_v8 = vld [vmem:[%s820_s5] ss:$0 sm:$0xff] }
  0x1b   :  { %530 = vmatpush.msra.mxu2 %v205_v11  ;;  %v155_v42 = vrot.slane %v152_v28, 2  ;;  %v156_v51 = vrot.slane %v152_v28, 3  ;;  %v157_v57 = vrot.slane %v152_v28, 4  ;;  %v158_v62 = vrot.slane %v152_v28, 5 }
  0x1c   :  { %529 = vmatpush.msrb.mxu3 %v206_v10  ;;  %217 = vmatpush.msra.mxu1 %v204_v13  ;;  %v167_v35 = vperm.slane %v159_v30, 0  ;;  %v162_v36 = vperm.slane %v154_v33, 0  ;;  %v168_v45 = vperm.slane %v160_v39, 0  ;;  %v682_v30 = vmov 0  }
  0x1d   :  { %532 = vmatpush.msra.mxu2 %v204_v13  ;;  %v163_v46 = vperm.slane %v155_v42, 0  ;;  %v164_v54 = vperm.slane %v156_v51, 0  ;;  %v165_v59 = vperm.slane %v157_v57, 0  ;;  %v166_v0 = vperm.slane %v158_v62, 0  ;;  %565 = vset.pattern.permute.xlu2 %v682_v30 }
  0x1e   :  { %531 = vmatpush.msrb.mxu3 %v205_v11  ;;  %218 = vmatpush.msra.mxu1 %v203_v14  ;;  %v570_v11 = vld [vmem:[%s821_s6] ss:$0 sm:$0xff] }
  0x1f   :  { %513 = vmatmul.msk.f32.gmra.mxu0 %vm86_vm0, %v743_v6  ;;  %519 = vmatmul.msk.f32.gmra.mxu3 %vm86_vm0, %v745_v7 }
  0x20   :  { %533 = vmatpush.msrb.mxu3 %v204_v13  ;;  %534 = vmatpush.msra.mxu2 %v203_v14 }
  0x21   :  { %219 = vmatpush.msra.mxu1 %v202_v15 }
  0x22   :  { %535 = vmatpush.msrb.mxu3 %v203_v14  ;;  %536 = vmatpush.msra.mxu2 %v202_v15 }
  0x23   :  { %220 = vmatpush.msra.mxu1 %v201_v16 }
  0x24   :  { %537 = vmatpush.msrb.mxu3 %v202_v15  ;;  %538 = vmatpush.msra.mxu2 %v201_v16 }
  0x25   :  { %221 = vmatpush.msra.mxu1 %v200_v18 }
  0x26   :  { %539 = vmatpush.msrb.mxu3 %v201_v16  ;;  %540 = vmatpush.msra.mxu2 %v200_v18 }
  0x27   :  { %514 = vmatmul.msk.f32.gmra.mxu0 %vm86_vm0, %v751_v12  ;;  %222 = vmatpush.msra.mxu1 %v199_v19 }
  0x28   :  { %541 = vmatpush.msrb.mxu3 %v200_v18  ;;  %542 = vmatpush.msra.mxu2 %v199_v19 }
  0x29   :  { %223 = vmatpush.msra.mxu1 %v198_v20 }
  0x2a   :  { %543 = vmatpush.msrb.mxu3 %v199_v19  ;;  %544 = vmatpush.msra.mxu2 %v198_v20 }
  0x2b   :  { %224 = vmatpush.msra.mxu1 %v197_v21 }
  0x2c   :  { %545 = vmatpush.msrb.mxu3 %v198_v20  ;;  %546 = vmatpush.msra.mxu2 %v197_v21 }
  0x2d   :  { %225 = vmatpush.msra.mxu1 %v196_v23 }
  0x2e   :  { %547 = vmatpush.msrb.mxu3 %v197_v21  ;;  %548 = vmatpush.msra.mxu2 %v196_v23 }
  0x2f   :  { %515 = vmatmul.msk.f32.gmra.mxu0 %vm86_vm0, %v755_v17  ;;  %226 = vmatpush.msra.mxu1 %v195_v25 }
  0x30   :  { %549 = vmatpush.msrb.mxu3 %v196_v23  ;;  %550 = vmatpush.msra.mxu2 %v195_v25 }
  0x31   :  { %227 = vmatpush.msra.mxu1 %v194_v26 }
  0x32   :  { %551 = vmatpush.msrb.mxu3 %v195_v25  ;;  %552 = vmatpush.msra.mxu2 %v194_v26 }
  0x33   :  { %228 = vmatpush.msra.mxu1 %v193_v27 }
  0x34   :  { %553 = vmatpush.msrb.mxu3 %v194_v26  ;;  %554 = vmatpush.msra.mxu2 %v193_v27 }
  0x36   :  { %555 = vmatpush.msrb.mxu3 %v193_v27 }
  0x37   :  { %516 = vmatmul.msk.f32.gmra.mxu0 %vm86_vm0, %v759_v22 }
  0x3f   :  { %517 = vmatmul.msk.f32.gmra.mxu0 %vm86_vm0, %v763_v24 }
  0x94   :  { %v128_v31 = vpop.f32.mrf.mxu0 }
  0x95   :  { %v177_v32 = vadd.f32 %v161_v29, %v128_v31 }
  0x97   :  { %v185_v34 = vmax.f32 %v177_v32, 0.0 }
  0x99   :  { %229 = vmatmul.f32.vlgmr.msra.gmra.mxu1 %v185_v34 }
  0x9a   :  { %v146_v37 = vpop.f32.mrf.mxu3 }
  0x9b   :  { %v183_v38 = vadd.f32 %v167_v35, %v146_v37 }
  0x9c   :  { %v131_v40 = vpop.f32.mrf.mxu0 }
  0x9d   :  { %v178_v41 = vadd.f32 %v162_v36, %v131_v40  ;;  %v191_v43 = vmax.f32 %v183_v38, 0.0 }
  0x9f   :  { %v186_v44 = vmax.f32 %v178_v41, 0.0  ;;  %247 = vmatmul.f32.vlgmr.msrb.gmra.mxu3 %v191_v43 }
  0xa1   :  { %232 = vmatmul.f32.gmra.mxu1 %v186_v44 }
  0xa2   :  { %v149_v47 = vpop.f32.mrf.mxu3 }
  0xa3   :  { %v184_v48 = vadd.f32 %v168_v45, %v149_v47  ;;  %v292_v47 = vld [vmem:[%s815_s0] sm:$0xff] }
  0xa4   :  { %v134_v49 = vpop.f32.mrf.mxu0 }
  0xa5   :  { %v179_v50 = vadd.f32 %v163_v46, %v134_v49  ;;  %v192_v52 = vmax.f32 %v184_v48, 0.0 }
  0xa7   :  { %v187_v53 = vmax.f32 %v179_v50, 0.0  ;;  %250 = vmatmul.f32.gmra.mxu3 %v192_v52  ;;  %v290_v50 = vlaneseq }
  0xa9   :  { %235 = vmatmul.f32.gmra.mxu1 %v187_v53  ;;  %v291_v53 = vand.u32 127, %v290_v50 }
  0xac   :  { %v137_v55 = vpop.f32.mrf.mxu0 }
  0xad   :  { %v180_v56 = vadd.f32 %v164_v54, %v137_v55 }
  0xaf   :  { %v188_v58 = vmax.f32 %v180_v56, 0.0 }
  0xb1   :  { %238 = vmatmul.f32.vlgmr.msra.gmra.mxu2 %v188_v58 }
  0xb4   :  { %v140_v60 = vpop.f32.mrf.mxu0 }
  0xb5   :  { %v181_v61 = vadd.f32 %v165_v59, %v140_v60 }
  0xb7   :  { %v189_v63 = vmax.f32 %v181_v61, 0.0 }
  0xb9   :  { %241 = vmatmul.f32.gmra.mxu2 %v189_v63 }
  0xbc   :  { %v143_v1 = vpop.f32.mrf.mxu0 }
  0xbd   :  { %v182_v2 = vadd.f32 %v166_v0, %v143_v1 }
  0xbf   :  { %v190_v3 = vmax.f32 %v182_v2, 0.0 }
  0xc1   :  { %244 = vmatmul.f32.gmra.mxu2 %v190_v3 }
 0x116   :  { %v230_v9 = vpop.f32.mrf.mxu1 }
 0x117   :  { %v231_v10 = vadd.f32 %v569_v8, %v230_v9 }
 0x119   :  { %v254_v13 = vmax.f32 %v231_v10, 0.0 }
 0x11b   :  { %v266_v14 = vmul.f32 %v570_v11, %v254_v13 }
 0x11d   :  { %274 = vadd.xlane.f32.xlu0 %v266_v14 }
 0x11e   :  { %v233_v15 = vpop.f32.mrf.mxu1 }
 0x11f   :  { %v234_v16 = vadd.f32 %v569_v8, %v233_v15 }
 0x121   :  { %v255_v18 = vmax.f32 %v234_v16, 0.0 }
 0x122   :  { %v248_v19 = vpop.f32.mrf.mxu3 }
 0x123   :  { %v267_v20 = vmul.f32 %v570_v11, %v255_v18  ;;  %v249_v21 = vadd.f32 %v569_v8, %v248_v19 }
 0x125   :  { %276 = vadd.xlane.f32.xlu0 %v267_v20  ;;  %v260_v23 = vmax.f32 %v249_v21, 0.0 }
 0x126   :  { %v236_v25 = vpop.f32.mrf.mxu1 }
 0x127   :  { %v237_v26 = vadd.f32 %v569_v8, %v236_v25  ;;  %v272_v28 = vmul.f32 %v570_v11, %v260_v23  ;;  %v357_v25 = vshrl.u32 %v290_v50, 7 }
 0x129   :  { %v256_v27 = vmax.f32 %v237_v26, 0.0  ;;  %567 = vset.pattern.permute.xlu1 %v357_v25  ;;  %566 = vset.pattern.permute.xlu0 %v357_v25 }
 0x12a   :  { %v251_v32 = vpop.f32.mrf.mxu3 }
 0x12b   :  { %v268_v29 = vmul.f32 %v570_v11, %v256_v27  ;;  %v252_v35 = vadd.f32 %v569_v8, %v251_v32 }
 0x12d   :  { %278 = vadd.xlane.f32.xlu1 %v268_v29  ;;  %286 = vadd.xlane.f32.xlu0 %v272_v28  ;;  %v261_v37 = vmax.f32 %v252_v35, 0.0 }
 0x12f   :  { %v273_v41 = vmul.f32 %v570_v11, %v261_v37 }
 0x134   :  { %v239_v31 = vpop.f32.mrf.mxu2 }
 0x135   :  { %v240_v33 = vadd.f32 %v569_v8, %v239_v31 }
 0x137   :  { %v257_v34 = vmax.f32 %v240_v33, 0.0 }
 0x139   :  { %v269_v36 = vmul.f32 %v570_v11, %v257_v34 }
 0x13b   :  { %280 = vadd.xlane.f32.xlu1 %v269_v36 }
 0x13c   :  { %v242_v38 = vpop.f32.mrf.mxu2 }
 0x13d   :  { %v243_v39 = vadd.f32 %v569_v8, %v242_v38 }
 0x13f   :  { %v258_v40 = vmax.f32 %v243_v39, 0.0 }
 0x141   :  { %v270_v42 = vmul.f32 %v570_v11, %v258_v40 }
 0x143   :  { %282 = vadd.xlane.f32.xlu2 %v270_v42  ;;  %288 = vadd.xlane.f32.xlu1 %v273_v41 }
 0x144   :  { %v245_v43 = vpop.f32.mrf.mxu2 }
 0x145   :  { %v246_v44 = vadd.f32 %v569_v8, %v245_v43 }
 0x147   :  { %v259_v45 = vmax.f32 %v246_v44, 0.0 }
 0x149   :  { %v271_v46 = vmul.f32 %v570_v11, %v259_v45 }
 0x14b   :  { %284 = vadd.xlane.f32.xlu2 %v271_v46 }
 0x163   :  { %294 = vperm.xlu2 %565, %v292_v47  }
 0x16b   :  { %568 = vset.pattern.permute.xlu2 %v357_v25 }
 0x190   :  { %v275_v48 = vpop.xlane.xlu0 %274 }
 0x191   :  { %v305_v57 = vperm.slane %v275_v48, %v291_v53 }
 0x198   :  { %v277_v51 = vpop.xlane.xlu0 %276 }
 0x199   :  { %v306_v55 = vperm.slane %v277_v51, %v291_v53 }
 0x19b   :  { %v314_v60 = vsel %vm313_vm1, %v306_v55, %v305_v57 }
 0x1a0   :  { %v279_v49 = vpop.xlane.xlu1 %278  ;;  %v287_v0 = vpop.xlane.xlu0 %286 }
 0x1a1   :  { %v307_v56 = vperm.slane %v279_v49, %v291_v53  ;;  %v311_v9 = vperm.slane %v287_v0, %v291_v53 }
 0x1a3   :  { %v316_v61 = vsel %vm315_vm2, %v307_v56, %v314_v60 }
 0x1ae   :  { %v281_v54 = vpop.xlane.xlu1 %280 }
 0x1af   :  { %v308_v58 = vperm.slane %v281_v54, %v291_v53 }
 0x1b1   :  { %v318_v63 = vsel %vm317_vm3, %v308_v58, %v316_v61 }
 0x1b6   :  { %v283_v52 = vpop.xlane.xlu2 %282  ;;  %v289_v3 = vpop.xlane.xlu1 %288 }
 0x1b7   :  { %v309_v59 = vperm.slane %v283_v52, %v291_v53  ;;  %v312_v10 = vperm.slane %v289_v3, %v291_v53 }
 0x1b9   :  { %v320_v2 = vsel %vm319_vm4, %v309_v59, %v318_v63 }
 0x1be   :  { %v285_v62 = vpop.xlane.xlu2 %284 }
 0x1bf   :  { %v310_v1 = vperm.slane %v285_v62, %v291_v53 }
 0x1c1   :  { %v322_v8 = vsel %vm321_vm5, %v310_v1, %v320_v2 }
 0x1c2   :  { %v324_v11 = vsel %vm323_vm6, %v311_v9, %v322_v8 }
 0x1c3   :  { %v326_v14 = vsel %vm325_vm7, %v312_v10, %v324_v11 }
 0x1c6   :  { %v295_v13 = vpop.permute.xlu2 %294 }
 0x1c7   :  { %vm296_vm9 = vcmp.ge.s32.totalorder %v291_v53, %v295_v13 }
 0x1c8   :  { %v328_v15 = vsel %vm296_vm9, -1e+30, %v326_v14 }
 0x1c9   :  { %v330_v16 = vsel %vm329_vm8, %v328_v15, -inf }
 0x1ca   :  { %331 = vmax.xlane.f32.xlu0 %v330_v16 }
 0x23d   :  { %v332_v18 = vpop.xlane.xlu0 %331 }
 0x23e   :  { %v333_v19 = vsub.f32 %v328_v15, %v332_v18 }
 0x240   :  { %v334_v20 = vmul.f32 1.442695, %v333_v19 }
 0x242   :  { %571 = vpow2.f32 %v334_v20 }
 0x248   :  { %v572_v21 = vpop.eup %571 }
 0x249   :  { %v336_v23 = vsel %vm329_vm8, %v572_v21, 0.0 }
 0x24a   :  { %337 = vadd.xlane.f32.xlu1 %v336_v23 }
 0x2bd   :  { %v338_v26 = vpop.xlane.xlu1 %337 }
 0x2be   :  { %573 = vrcp.f32 %v338_v26  ;;  %v350_v30 = vand.u32 2147483648, %v338_v26  ;;  %v348_v32 = vand.u32 2147483647, %v338_v26  ;;  %vm344_vm11 = vweird.f32 %v338_v26 }
 0x2c0   :  { %v351_v34 = vor.u32 1.1754944e-38, %v350_v30  ;;  %vm349_vm13 = vcmp.eq.f32.partialorder %v348_v32, 8.507059e+37 }
 0x2c4   :  { %v574_v27 = vpop.eup %573 }
 0x2c5   :  { %v340_v28 = vmul.f32 %v574_v27, %v338_v26  ;;  %vm345_vm10 = vweird.f32 %v574_v27 }
 0x2c6   :  { %vm346_vm12 = vmor %vm344_vm11, %vm345_vm10 }
 0x2c7   :  { %v341_v29 = vsub.f32 1.0, %v340_v28 }
 0x2c9   :  { %v342_v31 = vmul.f32 %v574_v27, %v341_v29 }
 0x2cb   :  { %v343_v33 = vadd.f32 %v574_v27, %v342_v31 }
 0x2cd   :  { %v347_v35 = vsel %vm346_vm12, %v574_v27, %v343_v33 }
 0x2ce   :  { %v352_v36 = vsel %vm349_vm13, %v351_v34, %v347_v35 }
 0x2cf   :  { %v353_v37 = vmul.f32 %v572_v21, %v352_v36 }
 0x2d1   :  { %v354_v38 = vsel %vm296_vm9, 0.0, %v353_v37 }
 0x2d2   :  { %v369_v39 = vperm.slane %v354_v38, 2  ;;  %v362_v40 = vperm.slane %v354_v38, 1  ;;  %v355_v41 = vperm.slane %v354_v38, 0  ;;  %v376_v42 = vperm.slane %v354_v38, 3 }
 0x2d3   :  { %v390_v43 = vperm.slane %v354_v38, 5  ;;  %v383_v44 = vperm.slane %v354_v38, 4  ;;  %v404_v45 = vperm.slane %v354_v38, 7  ;;  %v397_v46 = vperm.slane %v354_v38, 6 }
 0x2d4   :  { %374 = vperm.xlu2 %568, %v369_v39   ;;  %367 = vperm.xlu1 %567, %v362_v40  }
 0x2d5   :  { %360 = vperm.xlu0 %566, %v355_v41  }
 0x2dc   :  { %381 = vperm.xlu2 %568, %v376_v42   ;;  %395 = vperm.xlu1 %567, %v390_v43  }
 0x2e4   :  { %388 = vperm.xlu2 %568, %v383_v44   ;;  %409 = vperm.xlu1 %567, %v404_v45  }
 0x2ec   :  { %402 = vperm.xlu2 %568, %v397_v46  }
 0x32e   :  { %v375_v47 = vpop.permute.xlu2 %374 }
 0x32f   :  { %v413_v49 = vmul.f32 %v375_v47, %v751_v12 }
 0x331   :  { %v433_v52 = vsel %vm86_vm0, %v413_v49, 0.0 }
 0x332   :  { %v434_v54 = vrot.slane %v433_v52, 4 }
 0x336   :  { %v382_v48 = vpop.permute.xlu2 %381 }
 0x337   :  { %v414_v51 = vmul.f32 %v382_v48, %v755_v17  ;;  %v435_v17 = vadd.f32 %v434_v54, %v433_v52 }
 0x339   :  { %v440_v55 = vsel %vm86_vm0, %v414_v51, 0.0  ;;  %v436_v9 = vrot.slane %v435_v17, 2 }
 0x33a   :  { %v441_v60 = vrot.slane %v440_v55, 4 }
 0x33b   :  { %v437_v19 = vadd.f32 %v436_v9, %v435_v17 }
 0x33c   :  { %v442_v3 = vadd.f32 %v441_v60, %v440_v55 }
 0x33d   :  { %v438_v32 = vrot.slane %v437_v19, 1 }
 0x33e   :  { %v389_v50 = vpop.permute.xlu2 %388  ;;  %v443_v16 = vrot.slane %v442_v3, 2 }
 0x33f   :  { %v415_v53 = vmul.f32 %v389_v50, %v759_v22  ;;  %v439_v41 = vadd.f32 %v438_v32, %v437_v19 }
 0x340   :  { %v444_v29 = vadd.f32 %v443_v16, %v442_v3 }
 0x341   :  { %v447_v61 = vsel %vm86_vm0, %v415_v53, 0.0 }
 0x342   :  { %v448_v1 = vrot.slane %v447_v61, 4  ;;  %v445_v38 = vrot.slane %v444_v29, 1 }
 0x344   :  { %v449_v14 = vadd.f32 %v448_v1, %v447_v61  ;;  %v446_v48 = vadd.f32 %v445_v38, %v444_v29 }
 0x346   :  { %v403_v56 = vpop.permute.xlu2 %402  ;;  %v368_v57 = vpop.permute.xlu1 %367  ;;  %v450_v26 = vrot.slane %v449_v14, 2 }
 0x347   :  { %v412_v58 = vmul.f32 %v368_v57, %v743_v6  ;;  %v361_v59 = vpop.permute.xlu0 %360  ;;  %v417_v12 = vmul.f32 %v403_v56, %v737_v5 }
 0x348   :  { %v411_v62 = vmul.f32 %v361_v59, %v735_v4  ;;  %v451_v36 = vadd.f32 %v450_v26, %v449_v14 }
 0x349   :  { %v426_v63 = vsel %vm86_vm0, %v412_v58, 0.0  ;;  %v461_v8 = vsel %vm86_vm0, %v417_v12, 0.0 }
 0x34a   :  { %v427_v0 = vrot.slane %v426_v63, 4  ;;  %v419_v22 = vsel %vm86_vm0, %v411_v62, 0.0  ;;  %v462_v5 = vrot.slane %v461_v8, 4  ;;  %v452_v45 = vrot.slane %v451_v36, 1 }
 0x34b   :  { %v420_v2 = vrot.slane %v419_v22, 4 }
 0x34c   :  { %v428_v6 = vadd.f32 %v427_v0, %v426_v63  ;;  %v463_v27 = vadd.f32 %v462_v5, %v461_v8 }
 0x34d   :  { %v421_v10 = vadd.f32 %v420_v2, %v419_v22 }
 0x34e   :  { %v429_v11 = vrot.slane %v428_v6, 2  ;;  %v396_v13 = vpop.permute.xlu1 %395 }
 0x34f   :  { %v422_v15 = vrot.slane %v421_v10, 2  ;;  %v416_v4 = vmul.f32 %v396_v13, %v763_v24  ;;  %v464_v24 = vrot.slane %v463_v27, 2 }
 0x350   :  { %v430_v18 = vadd.f32 %v429_v11, %v428_v6 }
 0x351   :  { %v423_v20 = vadd.f32 %v422_v15, %v421_v10  ;;  %v454_v21 = vsel %vm86_vm0, %v416_v4, 0.0  ;;  %v465_v46 = vadd.f32 %v464_v24, %v463_v27 }
 0x352   :  { %v431_v23 = vrot.slane %v430_v18, 1  ;;  %v455_v25 = vrot.slane %v454_v21, 4 }
 0x353   :  { %v424_v28 = vrot.slane %v423_v20, 1  ;;  %v466_v53 = vrot.slane %v465_v46, 1 }
 0x354   :  { %v432_v30 = vadd.f32 %v431_v23, %v430_v18  ;;  %v456_v31 = vadd.f32 %v455_v25, %v454_v21 }
 0x355   :  { %v425_v33 = vadd.f32 %v424_v28, %v423_v20  ;;  %v467_v58 = vadd.f32 %v466_v53, %v465_v46 }
 0x356   :  { %v457_v34 = vrot.slane %v456_v31, 2  ;;  %v410_v35 = vpop.permute.xlu1 %409 }
 0x357   :  { %v418_v37 = vmul.f32 %v410_v35, %v745_v7  ;;  %v483_v39 = vsel %vm313_vm1, %v432_v30, %v425_v33  ;;  %v453_v7 = vadd.f32 %v452_v45, %v451_v36 }
 0x358   :  { %v458_v40 = vadd.f32 %v457_v34, %v456_v31  ;;  %v484_v47 = vsel %vm315_vm2, %v439_v41, %v483_v39 }
 0x359   :  { %v468_v42 = vsel %vm86_vm0, %v418_v37, 0.0  ;;  %v485_v51 = vsel %vm317_vm3, %v446_v48, %v484_v47 }
 0x35a   :  { %v459_v43 = vrot.slane %v458_v40, 1  ;;  %v469_v44 = vrot.slane %v468_v42, 4  ;;  %v486_v55 = vsel %vm319_vm4, %v453_v7, %v485_v51 }
 0x35c   :  { %v470_v49 = vadd.f32 %v469_v44, %v468_v42  ;;  %v460_v50 = vadd.f32 %v459_v43, %v458_v40 }
 0x35e   :  { %v471_v52 = vrot.slane %v470_v49, 2  ;;  %v487_v56 = vsel %vm321_vm5, %v460_v50, %v486_v55 }
 0x35f   :  { %v488_v60 = vsel %vm323_vm6, %v467_v58, %v487_v56 }
 0x360   :  { %v472_v54 = vadd.f32 %v471_v52, %v470_v49 }
 0x362   :  { %v473_v57 = vrot.slane %v472_v54, 1 }
 0x364   :  { %v474_v59 = vadd.f32 %v473_v57, %v472_v54 }
 0x366   :  { %v489_v61 = vsel %vm325_vm7, %v474_v59, %v488_v60 }
 0x367   :  { %491 = vst.msk [vmem:[#allocation8] sm:$0xff] %vm86_vm0, %v489_v61 }
 0x368   :  { %495 = vsyncadd [#allocation4], 96  ;;  %s498_s21 = sshll.u32 %s822_s7, 4  ;;  %s683_s22 = smov [#allocation8]   ;;  %s499_s21 = int_to_ptr.hbm [resolvable:$true] %s498_s21 }
 0x369   :  { %s496_s23 = sshll.u32 %s683_s22, 4  ;;  %s684_s24 = smov 32   ;;  %s497_s23 = int_to_ptr.vmem [resolvable:$true] %s496_s23 }
 0x36a   :  { %s685_s25 = smov 2  }
 0x36b   :  { %504 = dma.vmem_to_hbm [thread:$0]  %s497_s23, 32, %s499_s21, [#allocation4], %s684_s24, %s684_s24, %s685_s25  }
 0x36c   :  { %675 = dma.done.wait [#allocation4], 128  }
 0x36d   :  { %676 = vsyncadd [#allocation4], 4294967168 }
 0x36e   :  { %509 = vsyncpa [#allocation3], 1 }
 0x36f   :  { %510 = vsyncpa [#allocation6], 1 }
 0x370   :  { %511 = vsyncpa [#allocation4], 1 }

</bundles_post_ra>
